<compile_context>
chip_gen: v7x
topology: tpu7x:2x2x1
jax: 0.10.0
libtpu: 0.0.40
codegen_flags: <defaults>
</compile_context>

<pallas_src>
import jax
import jax.numpy as jnp
from jax import lax
from jax.experimental import pallas as pl
from jax.experimental.pallas import tpu as pltpu


# ------------------------- Pallas kernel -------------------------

def _star_fusion_kernel(spa_ref, spe_ref, ws_ref, bs_ref, wc_ref, aux_ref,
                        spa_out_ref, spe_out_ref):
    # spa_ref : (B, N, Di)     spe_ref : (B, M, Di)
    # ws_ref  : (2, Di, Di)    star linear weights, pre-transposed
    # bs_ref  : (2, Di)        star linear biases
    # wc_ref  : (2, Di, Do)    1x1-conv weights, pre-transposed
    # aux_ref : (6, Do)        [bc1, ln1_g, ln1_b, bc2, ln2_g, ln2_b]
    # outputs : (B, N, Do), (B, M, Do)
    B, N, _ = spa_ref.shape
    hp = lax.Precision.HIGHEST

    # Hoist parameter loads out of the (tiny, static) batch loops.
    w_star1 = ws_ref[0]                       # (Di, Di)
    w_star2 = ws_ref[1]
    b_star1 = bs_ref[0:1, :]                  # (1, Di)
    b_star2 = bs_ref[1:2, :]
    w_c1 = wc_ref[0]                          # (Di, Do)
    w_c2 = wc_ref[1]
    b_c1, g1, beta1 = aux_ref[0:1, :], aux_ref[1:2, :], aux_ref[2:3, :]
    b_c2, g2, beta2 = aux_ref[3:4, :], aux_ref[4:5, :], aux_ref[5:6, :]

    center_idx = N // 2 + 1

    # ---- Stage 1: star gate for ALL batches with one pair of matmuls ----
    rows = []
    for b in range(B):                                        # tiny static unroll
        center = spa_ref[b][center_idx:center_idx + 1, :]     # (1, Di)
        spe_mean = jnp.mean(spe_ref[b], axis=0, keepdims=True)  # (1, Di)
        rows.append(center + spe_mean)
    ss_in = rows[0] if B == 1 else jnp.concatenate(rows, axis=0)   # (B, Di)

    h1 = jnp.dot(ss_in, w_star1, precision=hp,
                 preferred_element_type=jnp.float32) + b_star1
    h2 = jnp.dot(ss_in, w_star2, precision=hp,
                 preferred_element_type=jnp.float32) + b_star2
    ss_all = jnp.maximum(h1 * h2, 0.0)                        # (B, Di) star + ReLU

    def layer_norm(x, g, b):                  # x: (rows, Do), biased variance, eps=1e-5
        mu = jnp.mean(x, axis=-1, keepdims=True)
        xc = x - mu
        var = jnp.mean(xc * xc, axis=-1, keepdims=True)
        return xc * lax.rsqrt(var + 1e-5) * g + b

    # ---- Stage 2: per-batch 1x1-conv (as matmul) + LayerNorm ----
    # B is a small compile-time constant -> static unroll; every op below is a
    # plain 2-D op (no batched dot_general, no mid-axis reductions).
    for b in range(B):
        ss = ss_all[b:b + 1, :]                               # (1, Di) gate row

        spa_p = jnp.dot(spa_ref[b] * ss, w_c1, precision=hp,
                        preferred_element_type=jnp.float32) + b_c1   # (N, Do)
        spe_p = jnp.dot(spe_ref[b] * ss, w_c2, precision=hp,
                        preferred_element_type=jnp.float32) + b_c2   # (M, Do)

        spa_out_ref[b] = layer_norm(spa_p, g1, beta1).astype(spa_out_ref.dtype)
        spe_out_ref[b] = layer_norm(spe_p, g2, beta2).astype(spe_out_ref.dtype)


# ------------------------- wrapper -------------------------

def spa_spe_star_fusion_forward(spa_token, spe_token, params):
    """spa_token: (B, N, Di), spe_token: (B, M, Di).  Returns ((B,N,Do),(B,M,Do))."""
    B, N, Di = spa_token.shape
    Bm, M, Dim = spe_token.shape
    assert B == Bm and Di == Dim
    assert N // 2 + 1 < N, "spa_token needs enough tokens for the center index"
    Do = params["conv1_w"].shape[0]
    f32 = jnp.float32

    # Parameter plumbing (plain JAX, done once): stack into few dense operands.
    ws = jnp.stack([params["star1_w"].T, params["star2_w"].T]).astype(f32)   # (2, Di, Di)
    bs = jnp.stack([params["star1_b"], params["star2_b"]]).astype(f32)       # (2, Di)
    wc = jnp.stack([params["conv1_w"].reshape(Do, Di).T,
                    params["conv2_w"].reshape(Do, Di).T]).astype(f32)        # (2, Di, Do)
    aux = jnp.stack([params["conv1_b"], params["ln1_g"], params["ln1_b"],
                     params["conv2_b"], params["ln2_g"], params["ln2_b"]]).astype(f32)  # (6, Do)

    flops = 2 * (2 * B * Di * Di) + 2 * B * (N + M) * Di * Do
    bytes_accessed = 4 * (B * N * Di + B * M * Di + 2 * Di * Di + 2 * Di
                          + 2 * Di * Do + 6 * Do + B * N * Do + B * M * Do)

    spa_out, spe_out = pl.pallas_call(
        _star_fusion_kernel,
        out_shape=(jax.ShapeDtypeStruct((B, N, Do), f32),
                   jax.ShapeDtypeStruct((B, M, Do), f32)),
        grid=(1,),
        in_specs=[
            pl.BlockSpec((B, N, Di), lambda i: (0, 0, 0)),
            pl.BlockSpec((B, M, Di), lambda i: (0, 0, 0)),
            pl.BlockSpec((2, Di, Di), lambda i: (0, 0, 0)),
            pl.BlockSpec((2, Di), lambda i: (0, 0)),
            pl.BlockSpec((2, Di, Do), lambda i: (0, 0, 0)),
            pl.BlockSpec((6, Do), lambda i: (0, 0)),
        ],
        out_specs=(
            pl.BlockSpec((B, N, Do), lambda i: (0, 0, 0)),
            pl.BlockSpec((B, M, Do), lambda i: (0, 0, 0)),
        ),
        compiler_params=pltpu.CompilerParams(
            dimension_semantics=("arbitrary",)),
        cost_estimate=pl.CostEstimate(
            flops=flops, transcendentals=B * (N + M),
            bytes_accessed=bytes_accessed),
    )(spa_token.astype(f32), spe_token.astype(f32), ws, bs, wc, aux)
    return spa_out, spe_out


# ------------------------- parameter init -------------------------

def init_params(key, ind_model, outd_model):
    ks = jax.random.split(key, 8)
    lim = 1.0 / float(jnp.sqrt(ind_model))   # fan_in for Linear and 1x1 Conv1d

    def u(k, shape):
        return jax.random.uniform(k, shape, jnp.float32, -lim, lim)

    return {
        "star1_w": u(ks[0], (ind_model, ind_model)),
        "star1_b": u(ks[1], (ind_model,)),
        "star2_w": u(ks[2], (ind_model, ind_model)),
        "star2_b": u(ks[3], (ind_model,)),
        "conv1_w": u(ks[4], (outd_model, ind_model, 1)),
        "conv1_b": u(ks[5], (outd_model,)),
        "conv2_w": u(ks[6], (outd_model, ind_model, 1)),
        "conv2_b": u(ks[7], (outd_model,)),
        # nn.LayerNorm default init: weight=1, bias=0
        "ln1_g": jnp.ones((outd_model,), jnp.float32),
        "ln1_b": jnp.zeros((outd_model,), jnp.float32),
        "ln2_g": jnp.ones((outd_model,), jnp.float32),
        "ln2_b": jnp.zeros((outd_model,), jnp.float32),
    }


# ------------------------- pure-JAX reference -------------------------

def reference_forward(spa_token, spe_token, params):
    N = spa_token.shape[1]
    Do, Di = params["conv1_w"].shape[0], params["conv1_w"].shape[1]
    hp = lax.Precision.HIGHEST

    center = spa_token[:, N // 2 + 1, :]
    spe_mean = spe_token.mean(axis=1)
    ss = center + spe_mean
    ss1 = jnp.dot(ss, params["star1_w"].T, precision=hp) + params["star1_b"]
    ss2 = jnp.dot(ss, params["star2_w"].T, precision=hp) + params["star2_b"]
    ss = jax.nn.relu(ss1 * ss2)[:, None, :]

    spa_s = spa_token * ss
    spe_s = spe_token * ss
    wc1 = params["conv1_w"].reshape(Do, Di)
    wc2 = params["conv2_w"].reshape(Do, Di)
    spa_p = jnp.einsum("bnd,od->bno", spa_s, wc1, precision=hp) + params["conv1_b"]
    spe_p = jnp.einsum("bmd,od->bmo", spe_s, wc2, precision=hp) + params["conv2_b"]

    def ln(x, g, b):
        mu = x.mean(-1, keepdims=True)
        var = ((x - mu) ** 2).mean(-1, keepdims=True)
        return (x - mu) / jnp.sqrt(var + 1e-5) * g + b

    return (ln(spa_p, params["ln1_g"], params["ln1_b"]),
            ln(spe_p, params["ln2_g"], params["ln2_b"]))


if __name__ == "__main__":
    # Small shapes consistent with the module: B=2, N=25 spatial tokens,
    # M=8 spectral tokens, ind_model=32, outd_model=32.
    B, N, M = 2, 25, 8
    ind_model, outd_model = 32, 32

    key = jax.random.PRNGKey(0)
    k_spa, k_spe, k_p = jax.random.split(key, 3)
    spa = jax.random.normal(k_spa, (B, N, ind_model), jnp.float32)
    spe = jax.random.normal(k_spe, (B, M, ind_model), jnp.float32)
    params = init_params(k_p, ind_model, outd_model)

    spa_out, spe_out = spa_spe_star_fusion_forward(spa, spe, params)
    spa_out = jax.block_until_ready(spa_out)
    spe_out = jax.block_until_ready(spe_out)

    spa_ref, spe_ref = reference_forward(spa, spe, params)
    assert spa_out.shape == (B, N, outd_model), spa_out.shape
    assert spe_out.shape == (B, M, outd_model), spe_out.shape
    assert jnp.allclose(spa_out, spa_ref, atol=1e-4, rtol=1e-4), \
        float(jnp.max(jnp.abs(spa_out - spa_ref)))
    assert jnp.allclose(spe_out, spe_ref, atol=1e-4, rtol=1e-4), \
        float(jnp.max(jnp.abs(spe_out - spe_ref)))
    print("KERNEL_OK")
</pallas_src>

<mosaic_0001>
module attributes {stable_mosaic.version = 11 : i64} {
  func.func @_star_fusion_kernel(%arg0: i32, %arg1: memref<2x25x32xf32, #tpu.memory_space<vmem>>, %arg2: memref<2x8x32xf32, #tpu.memory_space<vmem>>, %arg3: memref<2x32x32xf32, #tpu.memory_space<vmem>>, %arg4: memref<2x32xf32, #tpu.memory_space<vmem>>, %arg5: memref<2x32x32xf32, #tpu.memory_space<vmem>>, %arg6: memref<6x32xf32, #tpu.memory_space<vmem>>, %arg7: memref<2x25x32xf32, #tpu.memory_space<vmem>>, %arg8: memref<2x8x32xf32, #tpu.memory_space<vmem>>) attributes {dimension_semantics = [#tpu.dimension_semantics<arbitrary>], iteration_bounds = array<i64: 1>, scalar_prefetch = 0 : i64, scratch_operands = 0 : i64, tpu.core_type = #tpu.core_type<tc>, window_params = [{pipeline_mode = #tpu.pipeline_mode<synchronous>, transform_indices = @transform_0, window_bounds = array<i64: 2, 25, 32>}, {pipeline_mode = #tpu.pipeline_mode<synchronous>, transform_indices = @transform_1, window_bounds = array<i64: 2, 8, 32>}, {pipeline_mode = #tpu.pipeline_mode<synchronous>, transform_indices = @transform_2, window_bounds = array<i64: 2, 32, 32>}, {pipeline_mode = #tpu.pipeline_mode<synchronous>, transform_indices = @transform_3, window_bounds = array<i64: 2, 32>}, {pipeline_mode = #tpu.pipeline_mode<synchronous>, transform_indices = @transform_4, window_bounds = array<i64: 2, 32, 32>}, {pipeline_mode = #tpu.pipeline_mode<synchronous>, transform_indices = @transform_5, window_bounds = array<i64: 6, 32>}, {pipeline_mode = #tpu.pipeline_mode<synchronous>, transform_indices = @transform_6, window_bounds = array<i64: 2, 25, 32>}, {pipeline_mode = #tpu.pipeline_mode<synchronous>, transform_indices = @transform_7, window_bounds = array<i64: 2, 8, 32>}]} {
    %c0 = arith.constant 0 : index
    %c0_0 = arith.constant 0 : index
    %c0_1 = arith.constant 0 : index
    %0 = vector.load %arg3[%c0, %c0_0, %c0_1] : memref<2x32x32xf32, #tpu.memory_space<vmem>>, vector<1x32x32xf32>
    %1 = vector.shape_cast %0 : vector<1x32x32xf32> to vector<32x32xf32>
    %c1 = arith.constant 1 : index
    %c0_2 = arith.constant 0 : index
    %c0_3 = arith.constant 0 : index
    %2 = vector.load %arg3[%c1, %c0_2, %c0_3] : memref<2x32x32xf32, #tpu.memory_space<vmem>>, vector<1x32x32xf32>
    %3 = vector.shape_cast %2 : vector<1x32x32xf32> to vector<32x32xf32>
    %c0_4 = arith.constant 0 : index
    %c0_5 = arith.constant 0 : index
    %4 = vector.load %arg4[%c0_4, %c0_5] : memref<2x32xf32, #tpu.memory_space<vmem>>, vector<1x32xf32>
    %c1_6 = arith.constant 1 : index
    %c0_7 = arith.constant 0 : index
    %5 = vector.load %arg4[%c1_6, %c0_7] : memref<2x32xf32, #tpu.memory_space<vmem>>, vector<1x32xf32>
    %c0_8 = arith.constant 0 : index
    %c0_9 = arith.constant 0 : index
    %c0_10 = arith.constant 0 : index
    %6 = vector.load %arg5[%c0_8, %c0_9, %c0_10] : memref<2x32x32xf32, #tpu.memory_space<vmem>>, vector<1x32x32xf32>
    %7 = vector.shape_cast %6 : vector<1x32x32xf32> to vector<32x32xf32>
    %c1_11 = arith.constant 1 : index
    %c0_12 = arith.constant 0 : index
    %c0_13 = arith.constant 0 : index
    %8 = vector.load %arg5[%c1_11, %c0_12, %c0_13] : memref<2x32x32xf32, #tpu.memory_space<vmem>>, vector<1x32x32xf32>
    %9 = vector.shape_cast %8 : vector<1x32x32xf32> to vector<32x32xf32>
    %c0_14 = arith.constant 0 : index
    %c0_15 = arith.constant 0 : index
    %10 = vector.load %arg6[%c0_14, %c0_15] : memref<6x32xf32, #tpu.memory_space<vmem>>, vector<1x32xf32>
    %c1_16 = arith.constant 1 : index
    %c0_17 = arith.constant 0 : index
    %11 = vector.load %arg6[%c1_16, %c0_17] : memref<6x32xf32, #tpu.memory_space<vmem>>, vector<1x32xf32>
    %c2 = arith.constant 2 : index
    %c0_18 = arith.constant 0 : index
    %12 = vector.load %arg6[%c2, %c0_18] : memref<6x32xf32, #tpu.memory_space<vmem>>, vector<1x32xf32>
    %c3 = arith.constant 3 : index
    %c0_19 = arith.constant 0 : index
    %13 = vector.load %arg6[%c3, %c0_19] : memref<6x32xf32, #tpu.memory_space<vmem>>, vector<1x32xf32>
    %c4 = arith.constant 4 : index
    %c0_20 = arith.constant 0 : index
    %14 = vector.load %arg6[%c4, %c0_20] : memref<6x32xf32, #tpu.memory_space<vmem>>, vector<1x32xf32>
    %c5 = arith.constant 5 : index
    %c0_21 = arith.constant 0 : index
    %15 = vector.load %arg6[%c5, %c0_21] : memref<6x32xf32, #tpu.memory_space<vmem>>, vector<1x32xf32>
    %c0_22 = arith.constant 0 : index
    %c0_23 = arith.constant 0 : index
    %c0_24 = arith.constant 0 : index
    %16 = vector.load %arg1[%c0_22, %c0_23, %c0_24] : memref<2x25x32xf32, #tpu.memory_space<vmem>>, vector<1x25x32xf32>
    %17 = vector.shape_cast %16 : vector<1x25x32xf32> to vector<25x32xf32>
    %18 = vector.extract_strided_slice %17 {offsets = [13, 0], sizes = [1, 32], strides = [1, 1]} : vector<25x32xf32> to vector<1x32xf32>
    %c0_25 = arith.constant 0 : index
    %c0_26 = arith.constant 0 : index
    %c0_27 = arith.constant 0 : index
    %19 = vector.load %arg2[%c0_25, %c0_26, %c0_27] : memref<2x8x32xf32, #tpu.memory_space<vmem>>, vector<1x8x32xf32>
    %20 = vector.shape_cast %19 : vector<1x8x32xf32> to vector<8x32xf32>
    %cst = arith.constant dense<0.000000e+00> : vector<32xf32>
    %21 = vector.multi_reduction <add>, %20, %cst [0] : vector<8x32xf32> to vector<32xf32>
    %22 = vector.shape_cast %21 : vector<32xf32> to vector<1x32xf32>
    %cst_28 = arith.constant 8.000000e+00 : f32
    %23 = vector.broadcast %cst_28 : f32 to vector<1x32xf32>
    %24 = arith.divf %22, %23 : vector<1x32xf32>
    %25 = arith.addf %18, %24 : vector<1x32xf32>
    %c1_29 = arith.constant 1 : index
    %c0_30 = arith.constant 0 : index
    %c0_31 = arith.constant 0 : index
    %26 = vector.load %arg1[%c1_29, %c0_30, %c0_31] : memref<2x25x32xf32, #tpu.memory_space<vmem>>, vector<1x25x32xf32>
    %27 = vector.shape_cast %26 : vector<1x25x32xf32> to vector<25x32xf32>
    %28 = vector.extract_strided_slice %27 {offsets = [13, 0], sizes = [1, 32], strides = [1, 1]} : vector<25x32xf32> to vector<1x32xf32>
    %c1_32 = arith.constant 1 : index
    %c0_33 = arith.constant 0 : index
    %c0_34 = arith.constant 0 : index
    %29 = vector.load %arg2[%c1_32, %c0_33, %c0_34] : memref<2x8x32xf32, #tpu.memory_space<vmem>>, vector<1x8x32xf32>
    %30 = vector.shape_cast %29 : vector<1x8x32xf32> to vector<8x32xf32>
    %cst_35 = arith.constant dense<0.000000e+00> : vector<32xf32>
    %31 = vector.multi_reduction <add>, %30, %cst_35 [0] : vector<8x32xf32> to vector<32xf32>
    %32 = vector.shape_cast %31 : vector<32xf32> to vector<1x32xf32>
    %cst_36 = arith.constant 8.000000e+00 : f32
    %33 = vector.broadcast %cst_36 : f32 to vector<1x32xf32>
    %34 = arith.divf %32, %33 : vector<1x32xf32>
    %35 = arith.addf %28, %34 : vector<1x32xf32>
    %36 = tpu.concatenate %25, %35 in 0 : vector<1x32xf32>, vector<1x32xf32> -> vector<2x32xf32>
    %cst_37 = arith.constant dense<0.000000e+00> : vector<2x32xf32>
    %37 = tpu.matmul %36, %1, %cst_37 {dimension_numbers = #tpu.dot_dimension_numbers<[1], [0], [0], [1], [0, 0, 1, 1], [], []>, precision = #tpu.contract_precision<fp32>} : vector<2x32xf32>, vector<32x32xf32>, vector<2x32xf32> -> vector<2x32xf32>
    %38 = vector.broadcast %4 : vector<1x32xf32> to vector<2x32xf32>
    %39 = arith.addf %37, %38 : vector<2x32xf32>
    %cst_38 = arith.constant dense<0.000000e+00> : vector<2x32xf32>
    %40 = tpu.matmul %36, %3, %cst_38 {dimension_numbers = #tpu.dot_dimension_numbers<[1], [0], [0], [1], [0, 0, 1, 1], [], []>, precision = #tpu.contract_precision<fp32>} : vector<2x32xf32>, vector<32x32xf32>, vector<2x32xf32> -> vector<2x32xf32>
    %41 = vector.broadcast %5 : vector<1x32xf32> to vector<2x32xf32>
    %42 = arith.addf %40, %41 : vector<2x32xf32>
    %43 = arith.mulf %39, %42 : vector<2x32xf32>
    %cst_39 = arith.constant 0.000000e+00 : f32
    %44 = vector.broadcast %cst_39 : f32 to vector<2x32xf32>
    %45 = arith.maximumf %43, %44 : vector<2x32xf32>
    %46 = vector.extract_strided_slice %45 {offsets = [0, 0], sizes = [1, 32], strides = [1, 1]} : vector<2x32xf32> to vector<1x32xf32>
    %c0_40 = arith.constant 0 : index
    %c0_41 = arith.constant 0 : index
    %c0_42 = arith.constant 0 : index
    %47 = vector.load %arg1[%c0_40, %c0_41, %c0_42] : memref<2x25x32xf32, #tpu.memory_space<vmem>>, vector<1x25x32xf32>
    %48 = vector.shape_cast %47 : vector<1x25x32xf32> to vector<25x32xf32>
    %49 = vector.broadcast %46 : vector<1x32xf32> to vector<25x32xf32>
    %50 = arith.mulf %48, %49 : vector<25x32xf32>
    %cst_43 = arith.constant dense<0.000000e+00> : vector<25x32xf32>
    %51 = tpu.matmul %50, %7, %cst_43 {dimension_numbers = #tpu.dot_dimension_numbers<[1], [0], [0], [1], [0, 0, 1, 1], [], []>, precision = #tpu.contract_precision<fp32>} : vector<25x32xf32>, vector<32x32xf32>, vector<25x32xf32> -> vector<25x32xf32>
    %52 = vector.broadcast %10 : vector<1x32xf32> to vector<25x32xf32>
    %53 = arith.addf %51, %52 : vector<25x32xf32>
    %c0_44 = arith.constant 0 : index
    %c0_45 = arith.constant 0 : index
    %c0_46 = arith.constant 0 : index
    %54 = vector.load %arg2[%c0_44, %c0_45, %c0_46] : memref<2x8x32xf32, #tpu.memory_space<vmem>>, vector<1x8x32xf32>
    %55 = vector.shape_cast %54 : vector<1x8x32xf32> to vector<8x32xf32>
    %56 = vector.broadcast %46 : vector<1x32xf32> to vector<8x32xf32>
    %57 = arith.mulf %55, %56 : vector<8x32xf32>
    %cst_47 = arith.constant dense<0.000000e+00> : vector<8x32xf32>
    %58 = tpu.matmul %57, %9, %cst_47 {dimension_numbers = #tpu.dot_dimension_numbers<[1], [0], [0], [1], [0, 0, 1, 1], [], []>, precision = #tpu.contract_precision<fp32>} : vector<8x32xf32>, vector<32x32xf32>, vector<8x32xf32> -> vector<8x32xf32>
    %59 = vector.broadcast %13 : vector<1x32xf32> to vector<8x32xf32>
    %60 = arith.addf %58, %59 : vector<8x32xf32>
    %cst_48 = arith.constant dense<0.000000e+00> : vector<25xf32>
    %61 = vector.multi_reduction <add>, %53, %cst_48 [1] : vector<25x32xf32> to vector<25xf32>
    %62 = vector.shape_cast %61 : vector<25xf32> to vector<25x1xf32>
    %cst_49 = arith.constant 3.200000e+01 : f32
    %63 = vector.broadcast %cst_49 : f32 to vector<25x1xf32>
    %64 = arith.divf %62, %63 : vector<25x1xf32>
    %65 = vector.broadcast %64 : vector<25x1xf32> to vector<25x32xf32>
    %66 = arith.subf %53, %65 : vector<25x32xf32>
    %67 = arith.mulf %66, %66 : vector<25x32xf32>
    %cst_50 = arith.constant dense<0.000000e+00> : vector<25xf32>
    %68 = vector.multi_reduction <add>, %67, %cst_50 [1] : vector<25x32xf32> to vector<25xf32>
    %69 = vector.shape_cast %68 : vector<25xf32> to vector<25x1xf32>
    %cst_51 = arith.constant 3.200000e+01 : f32
    %70 = vector.broadcast %cst_51 : f32 to vector<25x1xf32>
    %71 = arith.divf %69, %70 : vector<25x1xf32>
    %cst_52 = arith.constant 9.99999974E-6 : f32
    %72 = vector.broadcast %cst_52 : f32 to vector<25x1xf32>
    %73 = arith.addf %71, %72 : vector<25x1xf32>
    %74 = math.rsqrt %73 : vector<25x1xf32>
    %75 = vector.broadcast %74 : vector<25x1xf32> to vector<25x32xf32>
    %76 = arith.mulf %66, %75 : vector<25x32xf32>
    %77 = vector.broadcast %11 : vector<1x32xf32> to vector<25x32xf32>
    %78 = arith.mulf %76, %77 : vector<25x32xf32>
    %79 = vector.broadcast %12 : vector<1x32xf32> to vector<25x32xf32>
    %80 = arith.addf %78, %79 : vector<25x32xf32>
    %c0_53 = arith.constant 0 : index
    %c0_54 = arith.constant 0 : index
    %c0_55 = arith.constant 0 : index
    %81 = vector.load %arg7[%c0_53, %c0_54, %c0_55] : memref<2x25x32xf32, #tpu.memory_space<vmem>>, vector<1x25x32xf32>
    %82 = vector.shape_cast %81 : vector<1x25x32xf32> to vector<25x32xf32>
    %83 = vector.shape_cast %80 : vector<25x32xf32> to vector<1x25x32xf32>
    tpu.vector_store %arg7[%c0_53, %c0_54, %c0_55], %83 {strides = array<i32>} : memref<2x25x32xf32, #tpu.memory_space<vmem>>, vector<1x25x32xf32>,
    %cst_56 = arith.constant dense<0.000000e+00> : vector<8xf32>
    %84 = vector.multi_reduction <add>, %60, %cst_56 [1] : vector<8x32xf32> to vector<8xf32>
    %85 = vector.shape_cast %84 : vector<8xf32> to vector<8x1xf32>
    %cst_57 = arith.constant 3.200000e+01 : f32
    %86 = vector.broadcast %cst_57 : f32 to vector<8x1xf32>
    %87 = arith.divf %85, %86 : vector<8x1xf32>
    %88 = vector.broadcast %87 : vector<8x1xf32> to vector<8x32xf32>
    %89 = arith.subf %60, %88 : vector<8x32xf32>
    %90 = arith.mulf %89, %89 : vector<8x32xf32>
    %cst_58 = arith.constant dense<0.000000e+00> : vector<8xf32>
    %91 = vector.multi_reduction <add>, %90, %cst_58 [1] : vector<8x32xf32> to vector<8xf32>
    %92 = vector.shape_cast %91 : vector<8xf32> to vector<8x1xf32>
    %cst_59 = arith.constant 3.200000e+01 : f32
    %93 = vector.broadcast %cst_59 : f32 to vector<8x1xf32>
    %94 = arith.divf %92, %93 : vector<8x1xf32>
    %cst_60 = arith.constant 9.99999974E-6 : f32
    %95 = vector.broadcast %cst_60 : f32 to vector<8x1xf32>
    %96 = arith.addf %94, %95 : vector<8x1xf32>
    %97 = math.rsqrt %96 : vector<8x1xf32>
    %98 = vector.broadcast %97 : vector<8x1xf32> to vector<8x32xf32>
    %99 = arith.mulf %89, %98 : vector<8x32xf32>
    %100 = vector.broadcast %14 : vector<1x32xf32> to vector<8x32xf32>
    %101 = arith.mulf %99, %100 : vector<8x32xf32>
    %102 = vector.broadcast %15 : vector<1x32xf32> to vector<8x32xf32>
    %103 = arith.addf %101, %102 : vector<8x32xf32>
    %c0_61 = arith.constant 0 : index
    %c0_62 = arith.constant 0 : index
    %c0_63 = arith.constant 0 : index
    %104 = vector.load %arg8[%c0_61, %c0_62, %c0_63] : memref<2x8x32xf32, #tpu.memory_space<vmem>>, vector<1x8x32xf32>
    %105 = vector.shape_cast %104 : vector<1x8x32xf32> to vector<8x32xf32>
    %106 = vector.shape_cast %103 : vector<8x32xf32> to vector<1x8x32xf32>
    tpu.vector_store %arg8[%c0_61, %c0_62, %c0_63], %106 {strides = array<i32>} : memref<2x8x32xf32, #tpu.memory_space<vmem>>, vector<1x8x32xf32>,
    %107 = vector.extract_strided_slice %45 {offsets = [1, 0], sizes = [1, 32], strides = [1, 1]} : vector<2x32xf32> to vector<1x32xf32>
    %c1_64 = arith.constant 1 : index
    %c0_65 = arith.constant 0 : index
    %c0_66 = arith.constant 0 : index
    %108 = vector.load %arg1[%c1_64, %c0_65, %c0_66] : memref<2x25x32xf32, #tpu.memory_space<vmem>>, vector<1x25x32xf32>
    %109 = vector.shape_cast %108 : vector<1x25x32xf32> to vector<25x32xf32>
    %110 = vector.broadcast %107 : vector<1x32xf32> to vector<25x32xf32>
    %111 = arith.mulf %109, %110 : vector<25x32xf32>
    %cst_67 = arith.constant dense<0.000000e+00> : vector<25x32xf32>
    %112 = tpu.matmul %111, %7, %cst_67 {dimension_numbers = #tpu.dot_dimension_numbers<[1], [0], [0], [1], [0, 0, 1, 1], [], []>, precision = #tpu.contract_precision<fp32>} : vector<25x32xf32>, vector<32x32xf32>, vector<25x32xf32> -> vector<25x32xf32>
    %113 = vector.broadcast %10 : vector<1x32xf32> to vector<25x32xf32>
    %114 = arith.addf %112, %113 : vector<25x32xf32>
    %c1_68 = arith.constant 1 : index
    %c0_69 = arith.constant 0 : index
    %c0_70 = arith.constant 0 : index
    %115 = vector.load %arg2[%c1_68, %c0_69, %c0_70] : memref<2x8x32xf32, #tpu.memory_space<vmem>>, vector<1x8x32xf32>
    %116 = vector.shape_cast %115 : vector<1x8x32xf32> to vector<8x32xf32>
    %117 = vector.broadcast %107 : vector<1x32xf32> to vector<8x32xf32>
    %118 = arith.mulf %116, %117 : vector<8x32xf32>
    %cst_71 = arith.constant dense<0.000000e+00> : vector<8x32xf32>
    %119 = tpu.matmul %118, %9, %cst_71 {dimension_numbers = #tpu.dot_dimension_numbers<[1], [0], [0], [1], [0, 0, 1, 1], [], []>, precision = #tpu.contract_precision<fp32>} : vector<8x32xf32>, vector<32x32xf32>, vector<8x32xf32> -> vector<8x32xf32>
    %120 = vector.broadcast %13 : vector<1x32xf32> to vector<8x32xf32>
    %121 = arith.addf %119, %120 : vector<8x32xf32>
    %cst_72 = arith.constant dense<0.000000e+00> : vector<25xf32>
    %122 = vector.multi_reduction <add>, %114, %cst_72 [1] : vector<25x32xf32> to vector<25xf32>
    %123 = vector.shape_cast %122 : vector<25xf32> to vector<25x1xf32>
    %cst_73 = arith.constant 3.200000e+01 : f32
    %124 = vector.broadcast %cst_73 : f32 to vector<25x1xf32>
    %125 = arith.divf %123, %124 : vector<25x1xf32>
    %126 = vector.broadcast %125 : vector<25x1xf32> to vector<25x32xf32>
    %127 = arith.subf %114, %126 : vector<25x32xf32>
    %128 = arith.mulf %127, %127 : vector<25x32xf32>
    %cst_74 = arith.constant dense<0.000000e+00> : vector<25xf32>
    %129 = vector.multi_reduction <add>, %128, %cst_74 [1] : vector<25x32xf32> to vector<25xf32>
    %130 = vector.shape_cast %129 : vector<25xf32> to vector<25x1xf32>
    %cst_75 = arith.constant 3.200000e+01 : f32
    %131 = vector.broadcast %cst_75 : f32 to vector<25x1xf32>
    %132 = arith.divf %130, %131 : vector<25x1xf32>
    %cst_76 = arith.constant 9.99999974E-6 : f32
    %133 = vector.broadcast %cst_76 : f32 to vector<25x1xf32>
    %134 = arith.addf %132, %133 : vector<25x1xf32>
    %135 = math.rsqrt %134 : vector<25x1xf32>
    %136 = vector.broadcast %135 : vector<25x1xf32> to vector<25x32xf32>
    %137 = arith.mulf %127, %136 : vector<25x32xf32>
    %138 = vector.broadcast %11 : vector<1x32xf32> to vector<25x32xf32>
    %139 = arith.mulf %137, %138 : vector<25x32xf32>
    %140 = vector.broadcast %12 : vector<1x32xf32> to vector<25x32xf32>
    %141 = arith.addf %139, %140 : vector<25x32xf32>
    %c1_77 = arith.constant 1 : index
    %c0_78 = arith.constant 0 : index
    %c0_79 = arith.constant 0 : index
    %142 = vector.load %arg7[%c1_77, %c0_78, %c0_79] : memref<2x25x32xf32, #tpu.memory_space<vmem>>, vector<1x25x32xf32>
    %143 = vector.shape_cast %142 : vector<1x25x32xf32> to vector<25x32xf32>
    %144 = vector.shape_cast %141 : vector<25x32xf32> to vector<1x25x32xf32>
    tpu.vector_store %arg7[%c1_77, %c0_78, %c0_79], %144 {strides = array<i32>} : memref<2x25x32xf32, #tpu.memory_space<vmem>>, vector<1x25x32xf32>,
    %cst_80 = arith.constant dense<0.000000e+00> : vector<8xf32>
    %145 = vector.multi_reduction <add>, %121, %cst_80 [1] : vector<8x32xf32> to vector<8xf32>
    %146 = vector.shape_cast %145 : vector<8xf32> to vector<8x1xf32>
    %cst_81 = arith.constant 3.200000e+01 : f32
    %147 = vector.broadcast %cst_81 : f32 to vector<8x1xf32>
    %148 = arith.divf %146, %147 : vector<8x1xf32>
    %149 = vector.broadcast %148 : vector<8x1xf32> to vector<8x32xf32>
    %150 = arith.subf %121, %149 : vector<8x32xf32>
    %151 = arith.mulf %150, %150 : vector<8x32xf32>
    %cst_82 = arith.constant dense<0.000000e+00> : vector<8xf32>
    %152 = vector.multi_reduction <add>, %151, %cst_82 [1] : vector<8x32xf32> to vector<8xf32>
    %153 = vector.shape_cast %152 : vector<8xf32> to vector<8x1xf32>
    %cst_83 = arith.constant 3.200000e+01 : f32
    %154 = vector.broadcast %cst_83 : f32 to vector<8x1xf32>
    %155 = arith.divf %153, %154 : vector<8x1xf32>
    %cst_84 = arith.constant 9.99999974E-6 : f32
    %156 = vector.broadcast %cst_84 : f32 to vector<8x1xf32>
    %157 = arith.addf %155, %156 : vector<8x1xf32>
    %158 = math.rsqrt %157 : vector<8x1xf32>
    %159 = vector.broadcast %158 : vector<8x1xf32> to vector<8x32xf32>
    %160 = arith.mulf %150, %159 : vector<8x32xf32>
    %161 = vector.broadcast %14 : vector<1x32xf32> to vector<8x32xf32>
    %162 = arith.mulf %160, %161 : vector<8x32xf32>
    %163 = vector.broadcast %15 : vector<1x32xf32> to vector<8x32xf32>
    %164 = arith.addf %162, %163 : vector<8x32xf32>
    %c1_85 = arith.constant 1 : index
    %c0_86 = arith.constant 0 : index
    %c0_87 = arith.constant 0 : index
    %165 = vector.load %arg8[%c1_85, %c0_86, %c0_87] : memref<2x8x32xf32, #tpu.memory_space<vmem>>, vector<1x8x32xf32>
    %166 = vector.shape_cast %165 : vector<1x8x32xf32> to vector<8x32xf32>
    %167 = vector.shape_cast %164 : vector<8x32xf32> to vector<1x8x32xf32>
    tpu.vector_store %arg8[%c1_85, %c0_86, %c0_87], %167 {strides = array<i32>} : memref<2x8x32xf32, #tpu.memory_space<vmem>>, vector<1x8x32xf32>,
    return
  }
  func.func @transform_0(%arg0: i32) -> (i32, i32, i32) {
    %c0_i32 = arith.constant 0 : i32
    %c0_i32_0 = arith.constant 0 : i32
    %c0_i32_1 = arith.constant 0 : i32
    %c0_i32_2 = arith.constant 0 : i32
    return %c0_i32, %c0_i32_0, %c0_i32_1 : i32, i32, i32
  }
  func.func @transform_1(%arg0: i32) -> (i32, i32, i32) {
    %c0_i32 = arith.constant 0 : i32
    %c0_i32_0 = arith.constant 0 : i32
    %c0_i32_1 = arith.constant 0 : i32
    %c0_i32_2 = arith.constant 0 : i32
    return %c0_i32, %c0_i32_0, %c0_i32_1 : i32, i32, i32
  }
  func.func @transform_2(%arg0: i32) -> (i32, i32, i32) {
    %c0_i32 = arith.constant 0 : i32
    %c0_i32_0 = arith.constant 0 : i32
    %c0_i32_1 = arith.constant 0 : i32
    %c0_i32_2 = arith.constant 0 : i32
    return %c0_i32, %c0_i32_0, %c0_i32_1 : i32, i32, i32
  }
  func.func @transform_3(%arg0: i32) -> (i32, i32) {
    %c0_i32 = arith.constant 0 : i32
    %c0_i32_0 = arith.constant 0 : i32
    %c0_i32_1 = arith.constant 0 : i32
    return %c0_i32, %c0_i32_0 : i32, i32
  }
  func.func @transform_4(%arg0: i32) -> (i32, i32, i32) {
    %c0_i32 = arith.constant 0 : i32
    %c0_i32_0 = arith.constant 0 : i32
    %c0_i32_1 = arith.constant 0 : i32
    %c0_i32_2 = arith.constant 0 : i32
    return %c0_i32, %c0_i32_0, %c0_i32_1 : i32, i32, i32
  }
  func.func @transform_5(%arg0: i32) -> (i32, i32) {
    %c0_i32 = arith.constant 0 : i32
    %c0_i32_0 = arith.constant 0 : i32
    %c0_i32_1 = arith.constant 0 : i32
    return %c0_i32, %c0_i32_0 : i32, i32
  }
  func.func @transform_6(%arg0: i32) -> (i32, i32, i32) {
    %c0_i32 = arith.constant 0 : i32
    %c0_i32_0 = arith.constant 0 : i32
    %c0_i32_1 = arith.constant 0 : i32
    %c0_i32_2 = arith.constant 0 : i32
    return %c0_i32, %c0_i32_0, %c0_i32_1 : i32, i32, i32
  }
  func.func @transform_7(%arg0: i32) -> (i32, i32, i32) {
    %c0_i32 = arith.constant 0 : i32
    %c0_i32_0 = arith.constant 0 : i32
    %c0_i32_1 = arith.constant 0 : i32
    %c0_i32_2 = arith.constant 0 : i32
    return %c0_i32, %c0_i32_0, %c0_i32_1 : i32, i32, i32
  }
}

</mosaic_0001>

<bundles_post_ra>
// kernel: tpu_custom_call.1
= control target key start
LH: loop header
LB: loop body
LE: loop exit
PB: predicated region body
PF: predicated region fallthrough
CT: control target
= control target key end

     0   :  { %13 = vsyncpa [#allocation3], 0  ;;  %s5491_s0 = inlined_call_operand.vmem [shape: f32[2,25,32], index: 0, kind: input, shape index: {}]   ;;  %s5492_s1 = inlined_call_operand.hbm [shape: f32[2,8,32], index: 1, kind: input, shape index: {}]   ;;  %s5493_s2 = inlined_call_operand.vmem [shape: f32[2,32,32], index: 2, kind: input, shape index: {}]   ;;  %s5494_s3 = inlined_call_operand.hbm [shape: f32[2,32], index: 3, kind: input, shape index: {}]   ;;  %s5495_s4 = inlined_call_operand.vmem [shape: f32[2,32,32], index: 4, kind: input, shape index: {}]   ;;  %s5496_s5 = inlined_call_operand.hbm [shape: f32[6,32], index: 5, kind: input, shape index: {}]   ;;  %s5497_s6 = inlined_call_operand.vmem [shape: f32[2,25,32], index: 6, kind: output, shape index: {0}]   ;;  %s5498_s7 = inlined_call_operand.hbm [shape: f32[2,8,32], index: 7, kind: output, shape index: {1}]  }
   0x1   :  { %14 = vsyncpa [#allocation6], 0 }
   0x2   :  { %15 = vsyncpa [#allocation4], 0  ;;  %s4698_s24 = smov [#allocation5]   ;;  %s4699_s26 = smov [#allocation2]  }
   0x3   :  { %s38_s25 = sshll.u32 %s4698_s24, 4  ;;  %s23_s27 = sshll.u32 %s4699_s26, 4  ;;  %s39_s25 = int_to_ptr.vmem [resolvable:$true] %s38_s25  ;;  %s4747_s27 = int_to_ptr.vmem [resolvable:$true] %s23_s27 }
   0x4   :  { %s4604_s30 = scalar_lea.hbm %s5494_s3, 32 }
   0x5   :  { %p4605_p0 = scmp.ne.s32.totalorder %s5494_s3, %s4604_s30  ;;  %p4608_p1 = scmp.lt.u32.totalorder %s4604_s30, %s5494_s3 }
   0x7   :  { %p4610_p2 = pnand %p4608_p1, %p4605_p0 }
   0x9   :  { %4613 = shalt.err (!%p4610_p2)
}
   0xa   :  { %s4614_s12 = scalar_lea.vmem %s39_s25, 32  ;;  %p4619_p4 = scmp.lt.s32.totalorder %s39_s25, %s39_s25 }
   0xb   :  { %p4615_p3 = scmp.ne.s32.totalorder %s39_s25, %s4614_s12  ;;  %p4620_p5 = scmp.lt.s32.totalorder %s4614_s12, %s4614_s12 }
   0xd   :  { %p4621_p6 = por %p4620_p5, %p4619_p4 }
   0xf   :  { %p4622_p7 = pnand %p4621_p6, %p4615_p3 }
  0x11   :  { %4625 = shalt.err (!%p4622_p7)
}
  0x12   :  { %41 = dma.hbm_to_vmem [thread:$0]  %s5494_s3, 32, %s39_s25, [#allocation6]  }
  0x13   :  { %s4626_s17 = scalar_lea.hbm %s5492_s1, 256 }
  0x14   :  { %p4627_p8 = scmp.ne.s32.totalorder %s5492_s1, %s4626_s17  ;;  %p4630_p9 = scmp.lt.u32.totalorder %s4626_s17, %s5492_s1 }
  0x16   :  { %p4632_p10 = pnand %p4630_p9, %p4627_p8 }
  0x18   :  { %4635 = shalt.err (!%p4632_p10)
}
  0x19   :  { %s4636_s22 = scalar_lea.vmem %s4747_s27, 256  ;;  %p4641_p12 = scmp.lt.s32.totalorder %s4747_s27, %s4747_s27 }
  0x1a   :  { %p4637_p11 = scmp.ne.s32.totalorder %s4747_s27, %s4636_s22  ;;  %p4642_p13 = scmp.lt.s32.totalorder %s4636_s22, %s4636_s22 }
  0x1c   :  { %p4643_p0 = por %p4642_p13, %p4641_p12 }
  0x1e   :  { %p4644_p1 = pnand %p4643_p0, %p4637_p11 }
  0x20   :  { %4647 = shalt.err (!%p4644_p1)
}
  0x21   :  { %s4700_s3 = smov 128   ;;  %s4701_s23 = smov 8  }
  0x22   :  { %29 = dma.hbm_to_vmem [thread:$0]  %s5492_s1, 256, %s4747_s27, [#allocation3], %s4700_s3, %s4700_s3, %s4701_s23  }
  0x23   :  { %s4702_s26 = smov [#allocation7]   ;;  %s4648_s8 = scalar_lea.hbm %s5496_s5, 128 }
  0x24   :  { %s50_s28 = sshll.u32 %s4702_s26, 4  ;;  %p4649_p2 = scmp.ne.s32.totalorder %s5496_s5, %s4648_s8  ;;  %s51_s28 = int_to_ptr.vmem [resolvable:$true] %s50_s28 }
  0x25   :  { %p4652_p3 = scmp.lt.u32.totalorder %s4648_s8, %s5496_s5 }
  0x27   :  { %p4654_p4 = pnand %p4652_p3, %p4649_p2 }
  0x29   :  { %4657 = shalt.err (!%p4654_p4)
}
  0x2a   :  { %s4658_s13 = scalar_lea.vmem %s51_s28, 128  ;;  %p4663_p6 = scmp.lt.s32.totalorder %s51_s28, %s51_s28 }
  0x2b   :  { %p4659_p5 = scmp.ne.s32.totalorder %s51_s28, %s4658_s13  ;;  %p4664_p7 = scmp.lt.s32.totalorder %s4658_s13, %s4658_s13 }
  0x2d   :  { %p4665_p8 = por %p4664_p7, %p4663_p6 }
  0x2f   :  { %p4666_p9 = pnand %p4665_p8, %p4659_p5 }
  0x31   :  { %4669 = shalt.err (!%p4666_p9)
}
  0x32   :  { %53 = dma.hbm_to_vmem [thread:$0]  %s5496_s5, 128, %s51_s28, [#allocation6]  }
  0x33   :  { %4692 = dma.done.wait [#allocation3], 256  }
  0x34   :  { %4693 = vsyncadd [#allocation3], 4294967040 }
  0x35   :  { %4694 = dma.done.wait [#allocation6], 160  }
  0x36   :  { %4695 = vsyncadd [#allocation6], 4294967136  ;;  %v4703_v0 = vmov 0.0|0.0   ;;  %vm4704_vm0 = vmmov 0   ;;  %v4705_v1 = vmov 0.0   ;;  %v63_v2 = vld [vmem:[%s5493_s2] sm:$0xff] }
  0x37   :  { %4243 = vmatprep.subr.bf16.mxu0 %v4703_v0  ;;  %4279 = vmatprep.subr.bf16.mxu1 %v4703_v0  ;;  %v64_v3 = vld [vmem:[%s5493_s2 + $0x8] sm:$0xff]  ;;  %v3570_v4 = vld [vmem:[%s5493_s2 + $0x20] sm:$0xff]  ;;  %v134_v5 = vand.u32 4294901760, %v63_v2  ;;  %v65_v9 = vld [vmem:[%s5493_s2 + $0x10] sm:$0xff]  ;;  %vm94_vm1 = vcmask 261120   ;;  %vm124_vm2 = vcmask 1040384  }
  0x38   :  { %3819 = vmatprep.mubr.msk.f32.mxu0 %vm4704_vm0, %v4705_v1  ;;  %3885 = vmatprep.mubr.msk.f32.mxu1 %vm4704_vm0, %v4705_v1  ;;  %v137_v6 = vand.u32 4294901760, %v64_v3  ;;  %v3571_v7 = vld [vmem:[%s5493_s2 + $0x28] sm:$0xff]  ;;  %v623_v8 = vand.u32 4294901760, %v3570_v4  ;;  %v66_v10 = vld [vmem:[%s5493_s2 + $0x18] sm:$0xff]  ;;  %v140_v12 = vand.u32 4294901760, %v65_v9  ;;  %v3572_v14 = vld [vmem:[%s5493_s2 + $0x30] sm:$0xff] }
  0x39   :  { %v626_v11 = vand.u32 4294901760, %v3571_v7  ;;  %v143_v13 = vand.u32 4294901760, %v66_v10  ;;  %v3573_v15 = vld [vmem:[%s5493_s2 + $0x38] sm:$0xff]  ;;  %v4825_v17 = vld [vmem:[#allocation2] sm:$0xff]  ;;  %v4827_v18 = vld [vmem:[#allocation2 + $0x8] sm:$0xff]  ;;  %v629_v21 = vand.u32 4294901760, %v3572_v14  ;;  %v4847_v36 = vsub.f32 %v63_v2, %v134_v5 }
  0x3a   :  { %v4823_v16 = vpack.c.bf16 %v137_v6, %v134_v5  ;;  %v632_v22 = vand.u32 4294901760, %v3573_v15  ;;  %v95_v23 = vsel %vm94_vm1, %v4825_v17, 0.0  ;;  %v109_v25 = vsel %vm94_vm1, %v4827_v18, 0.0  ;;  %v4856_v40 = vld [vmem:[%s5491_s0 + $0x8] sm:$0xff]  ;;  %s4706_s17 = smov [#allocation8]  }
  0x3b   :  { %v4829_v19 = vpack.c.bf16 %v626_v11, %v623_v8  ;;  %v4832_v20 = vpack.c.bf16 %v143_v13, %v140_v12  ;;  %v96_v24 = vrot.slane %v95_v23, 4  ;;  %v110_v27 = vrot.slane %v109_v25, 4  ;;  %v4863_v44 = vld [vmem:[%s5491_s0 + $0x28] sm:$0xff]  ;;  %s3555_s18 = sshll.u32 %s4706_s17, 4  ;;  %s3556_s18 = int_to_ptr.vmem [resolvable:$true] %s3555_s18 }
  0x3c   :  { %4245 = vmatpush3.bf16.msra.mxu0 %v4823_v16  ;;  %v4841_v26 = vpack.c.bf16 %v632_v22, %v629_v21  ;;  %v4849_v37 = vsub.f32 %v64_v3, %v137_v6  ;;  %v4851_v39 = vsub.f32 %v3570_v4, %v623_v8  ;;  %v4858_v42 = vsub.f32 %v3571_v7, %v626_v11  ;;  %s4670_s19 = scalar_lea.vmem %s3556_s18, 256  ;;  %p4675_p11 = scmp.lt.s32.totalorder %s3556_s18, %s3556_s18 }
  0x3d   :  { %4281 = vmatpush3.bf16.msra.mxu1 %v4829_v19  ;;  %4246 = vmatprep.subr.bf16.mxu0 %v4703_v0  ;;  %v97_v28 = vadd.f32 %v96_v24, %v95_v23  ;;  %v111_v29 = vadd.f32 %v110_v27, %v109_v25  ;;  %v215_v47 = vand.u32 4294901760, %v4847_v36  ;;  %v4868_v49 = vsub.f32 %v65_v9, %v140_v12  ;;  %p4671_p10 = scmp.ne.s32.totalorder %s3556_s18, %s4670_s19  ;;  %p4676_p12 = scmp.lt.s32.totalorder %s4670_s19, %s4670_s19 }
  0x3e   :  { %4282 = vmatprep.subr.bf16.mxu1 %v4703_v0  ;;  %v222_v48 = vand.u32 4294901760, %v4849_v37  ;;  %v4870_v50 = vsub.f32 %v66_v10, %v143_v13  ;;  %v704_v52 = vand.u32 4294901760, %v4851_v39  ;;  %v4874_v53 = vsub.f32 %v3572_v14, %v629_v21 }
  0x3f   :  { %v98_v30 = vrot.slane %v97_v28, 2  ;;  %v112_v31 = vrot.slane %v111_v29, 2  ;;  %v4876_v54 = vsub.f32 %v3573_v15, %v632_v22  ;;  %v711_v56 = vand.u32 4294901760, %v4858_v42  ;;  %p4677_p13 = por %p4676_p12, %p4675_p11 }
  0x40   :  { %4248 = vmatpush3.bf16.msra.mxu0 %v4832_v20  ;;  %v216_v58 = vsub.f32 %v4847_v36, %v215_v47  ;;  %v223_v59 = vsub.f32 %v4849_v37, %v222_v48  ;;  %v705_v61 = vsub.f32 %v4851_v39, %v704_v52  ;;  %v229_v62 = vand.u32 4294901760, %v4868_v49 }
  0x41   :  { %4284 = vmatpush3.bf16.msra.mxu1 %v4841_v26  ;;  %4249 = vmatprep.subr.bf16.mxu0 %v4703_v0  ;;  %v99_v32 = vadd.f32 %v98_v30, %v97_v28  ;;  %v113_v33 = vadd.f32 %v112_v31, %v111_v29  ;;  %v236_v63 = vand.u32 4294901760, %v4870_v50  ;;  %v712_v3 = vsub.f32 %v4858_v42, %v711_v56  ;;  %p4678_p0 = pnand %p4677_p13, %p4671_p10 }
  0x42   :  { %4285 = vmatprep.subr.bf16.mxu1 %v4703_v0  ;;  %v718_v4 = vand.u32 4294901760, %v4874_v53  ;;  %v725_v5 = vand.u32 4294901760, %v4876_v54  ;;  %v217_v7 = vand.u32 4294901760, %v216_v58  ;;  %v224_v9 = vand.u32 4294901760, %v223_v59 }
  0x43   :  { %v100_v34 = vrot.slane %v99_v32, 1  ;;  %v114_v35 = vrot.slane %v113_v33, 1  ;;  %v230_v10 = vsub.f32 %v4868_v49, %v229_v62  ;;  %v237_v11 = vsub.f32 %v4870_v50, %v236_v63 }
  0x44   :  { %v706_v12 = vand.u32 4294901760, %v705_v61  ;;  %v713_v13 = vand.u32 4294901760, %v712_v3  ;;  %v719_v14 = vsub.f32 %v4874_v53, %v718_v4  ;;  %v726_v15 = vsub.f32 %v4876_v54, %v725_v5 }
  0x45   :  { %v101_v38 = vadd.f32 %v100_v34, %v99_v32  ;;  %v115_v41 = vadd.f32 %v114_v35, %v113_v33  ;;  %v4250_v23 = vpack.c.bf16 %v224_v9, %v217_v7  ;;  %v231_v24 = vand.u32 4294901760, %v230_v10 }
  0x46   :  { %v4286_v25 = vpack.c.bf16 %v713_v13, %v706_v12  ;;  %v238_v27 = vand.u32 4294901760, %v237_v11  ;;  %v720_v28 = vand.u32 4294901760, %v719_v14  ;;  %v727_v29 = vand.u32 4294901760, %v726_v15 }
  0x47   :  { %v103_v43 = vmul.f32 0.125, %v101_v38  ;;  %v116_v45 = vmul.f32 0.125, %v115_v41  ;;  %v4256_v33 = vpack.c.bf16 %v4849_v37, %v4847_v36  ;;  %v4292_v34 = vpack.c.bf16 %v4858_v42, %v4851_v39  ;;  %v75_v42 = vld [vmem:[%s5495_s4 + $0x8] sm:$0xff] }
  0x48   :  { %v4253_v31 = vpack.c.bf16 %v238_v27, %v231_v24  ;;  %v4289_v32 = vpack.c.bf16 %v727_v29, %v720_v28  ;;  %v4259_v35 = vpack.c.bf16 %v4870_v50, %v4868_v49  ;;  %v4295_v38 = vpack.c.bf16 %v4876_v54, %v4874_v53 }
  0x49   :  { %v104_v46 = vadd.f32 %v103_v43, %v4856_v40  ;;  %v117_v51 = vadd.f32 %v4863_v44, %v116_v45  ;;  %v4268_v41 = vpack.c.bf16 %v222_v48, %v215_v47  ;;  %v4304_v43 = vpack.c.bf16 %v711_v56, %v704_v52  ;;  %v3577_v47 = vld [vmem:[%s5495_s4 + $0x38] sm:$0xff] }
  0x4a   :  { %v4271_v36 = vpack.c.bf16 %v236_v63, %v229_v62  ;;  %v4307_v37 = vpack.c.bf16 %v725_v5, %v718_v4  ;;  %v1137_v48 = vand.u32 4294901760, %v75_v42  ;;  %v1765_v50 = vand.u32 4294901760, %v3577_v47  ;;  %v77_v52 = vld [vmem:[%s5495_s4 + $0x18] sm:$0xff] }
  0x4b   :  { %v119_v55 = vrot.slane %v104_v46, 5  ;;  %v122_v57 = vrot.slane %v117_v51, 4  ;;  %v3576_v46 = vld [vmem:[%s5495_s4 + $0x30] sm:$0xff]  ;;  %vm2249_vm3 = vcmask 253952  }
  0x4c   :  { %v1762_v49 = vand.u32 4294901760, %v3576_v46  ;;  %v76_v51 = vld [vmem:[%s5495_s4 + $0x10] sm:$0xff]  ;;  %v1251_v63 = vsub.f32 %v75_v42, %v1137_v48 }
  0x4d   :  { %v125_v60 = vsel %vm124_vm2, %v119_v55, %v122_v57  ;;  %v1140_v54 = vand.u32 4294901760, %v76_v51  ;;  %v1143_v55 = vand.u32 4294901760, %v77_v52 }
  0x4e   :  { %v131_v2 = vsel %vm94_vm1, %v125_v60, 0  ;;  %v5018_v58 = vpack.c.bf16 %v1765_v50, %v1762_v49  ;;  %v1252_v5 = vand.u32 4294901760, %v1251_v63  ;;  %v1850_v7 = vsub.f32 %v3576_v46, %v1762_v49  ;;  %v3579_v46 = vld [vmem:[#allocation5] ss:$0 sm:$0xff] }
  0x4f   :  { %v4896_v6 = vand.u32 4294901760, %v131_v2  ;;  %v5021_v60 = vpack.c.bf16 %v1143_v55, %v1140_v54  ;;  %v1258_v15 = vsub.f32 %v76_v51, %v1140_v54 }
  0x50   :  { %v1253_v11 = vsub.f32 %v1251_v63, %v1252_v5  ;;  %v1851_v13 = vand.u32 4294901760, %v1850_v7 }
  0x51   :  { %v203_v8 = vsub.f32 %v131_v2, %v4896_v6  ;;  %v1259_v28 = vand.u32 4294901760, %v1258_v15 }
  0x53   :  { %v204_v21 = vand.u32 4294901760, %v203_v8 }
  0x55   :  { %v205_v22 = vsub.f32 %v203_v8, %v204_v21 }
  0x57   :  { %v206_v30 = vand.u32 4294901760, %v205_v22  ;;  %v1254_v22 = vand.u32 4294901760, %v1253_v11 }
  0x59   :  { %3820 = vmatmul.mubr.f32.vlgmr.msra.gmra.mrb[0].mxu0 %v206_v30  ;;  %3886 = vmatmul.mubr.f32.vlgmr.msra.gmra.mrb[0].mxu1 %v206_v30 }
  0x5a   :  { %4251 = vmatpush3.bf16.msra.mxu0 %v4250_v23  ;;  %4287 = vmatpush3.bf16.msra.mxu1 %v4286_v25  ;;  %v1265_v23 = vsub.f32 %v77_v52, %v1143_v55  ;;  %v1852_v25 = vsub.f32 %v1850_v7, %v1851_v13 }
  0x5b   :  { %4252 = vmatprep.subr.bf16.mxu0 %v4703_v0  ;;  %4288 = vmatprep.subr.bf16.mxu1 %v4703_v0 }
  0x5c   :  { %3830 = vmatprep.mubr.msk.f32.mxu0 %vm4704_vm0, %v4705_v1  ;;  %3896 = vmatprep.mubr.msk.f32.mxu1 %vm4704_vm0, %v4705_v1  ;;  %v1266_v30 = vand.u32 4294901760, %v1265_v23 }
  0x5e   :  { %4254 = vmatpush3.bf16.msra.mxu0 %v4253_v31  ;;  %4290 = vmatpush3.bf16.msra.mxu1 %v4289_v32  ;;  %v1853_v31 = vand.u32 4294901760, %v1852_v25  ;;  %v5053_v42 = vpack.c.bf16 %v1266_v30, %v1259_v28 }
  0x5f   :  { %4255 = vmatprep.subr.bf16.mxu0 %v4703_v0  ;;  %4291 = vmatprep.subr.bf16.mxu1 %v4703_v0 }
  0x61   :  { %3831 = vmatmul.mubr.f32.vlgmr.msra.gmra.mrb[0].mxu0 %v4896_v6  ;;  %3897 = vmatmul.mubr.f32.vlgmr.msra.gmra.mrb[0].mxu1 %v4896_v6 }
  0x62   :  { %4257 = vmatpush3.bf16.msra.mxu0 %v4256_v33  ;;  %4293 = vmatpush3.bf16.msra.mxu1 %v4292_v34  ;;  %v1260_v33 = vsub.f32 %v1258_v15, %v1259_v28  ;;  %v1267_v34 = vsub.f32 %v1265_v23, %v1266_v30 }
  0x63   :  { %4258 = vmatprep.subr.bf16.mxu0 %v4703_v0  ;;  %4294 = vmatprep.subr.bf16.mxu1 %v4703_v0 }
  0x64   :  { %3841 = vmatprep.mubr.msk.f32.mxu0 %vm4704_vm0, %v4705_v1  ;;  %3907 = vmatprep.mubr.msk.f32.mxu1 %vm4704_vm0, %v4705_v1 }
  0x66   :  { %4260 = vmatpush3.bf16.msra.mxu0 %v4259_v35  ;;  %4296 = vmatpush3.bf16.msra.mxu1 %v4295_v38  ;;  %v1261_v38 = vand.u32 4294901760, %v1260_v33 }
  0x67   :  { %4261 = vmatprep.subr.bf16.mxu0 %v4703_v0  ;;  %4297 = vmatprep.subr.bf16.mxu1 %v4703_v0 }
  0x69   :  { %3842 = vmatmul.mubr.f32.vlgmr.msra.gmra.mrb[0].mxu0 %v203_v8  ;;  %3908 = vmatmul.mubr.f32.vlgmr.msra.gmra.mrb[0].mxu1 %v203_v8  ;;  %v1857_v8 = vsub.f32 %v3577_v47, %v1765_v50  ;;  %v3580_v47 = vld [vmem:[#allocation5 + $0x1] ss:$0 sm:$0xff] }
  0x6a   :  { %4263 = vmatpush3.bf16.msra.mxu0 %v4823_v16  ;;  %4299 = vmatpush3.bf16.msra.mxu1 %v4829_v19 }
  0x6b   :  { %4264 = vmatprep.subr.bf16.mxu0 %v4703_v0  ;;  %4300 = vmatprep.subr.bf16.mxu1 %v4703_v0  ;;  %v1858_v14 = vand.u32 4294901760, %v1857_v8 }
  0x6c   :  { %3852 = vmatprep.mubr.msk.f32.mxu0 %vm4704_vm0, %v4705_v1  ;;  %3918 = vmatprep.mubr.msk.f32.mxu1 %vm4704_vm0, %v4705_v1 }
  0x6d   :  { %v1859_v27 = vsub.f32 %v1857_v8, %v1858_v14 }
  0x6e   :  { %4266 = vmatpush3.bf16.msra.mxu0 %v4832_v20  ;;  %4302 = vmatpush3.bf16.msra.mxu1 %v4841_v26 }
  0x6f   :  { %4267 = vmatprep.subr.bf16.mxu0 %v4703_v0  ;;  %4303 = vmatprep.subr.bf16.mxu1 %v4703_v0  ;;  %v1860_v32 = vand.u32 4294901760, %v1859_v27 }
  0x71   :  { %3853 = vmatmul.mubr.f32.vlgmr.msra.gmra.mrb[0].mxu0 %v204_v21  ;;  %3919 = vmatmul.mubr.f32.vlgmr.msra.gmra.mrb[0].mxu1 %v204_v21  ;;  %v5035_v35 = vpack.c.bf16 %v1860_v32, %v1853_v31 }
  0x72   :  { %4269 = vmatpush3.bf16.msra.mxu0 %v4268_v41  ;;  %4305 = vmatpush3.bf16.msra.mxu1 %v4304_v43  ;;  %v1268_v41 = vand.u32 4294901760, %v1267_v34 }
  0x73   :  { %4270 = vmatprep.subr.bf16.mxu0 %v4703_v0  ;;  %4306 = vmatprep.subr.bf16.mxu1 %v4703_v0 }
  0x74   :  { %3863 = vmatprep.mubr.msk.f32.mxu0 %vm4704_vm0, %v4705_v1  ;;  %3929 = vmatprep.mubr.msk.f32.mxu1 %vm4704_vm0, %v4705_v1  ;;  %v5037_v43 = vpack.c.bf16 %v1268_v41, %v1261_v38 }
  0x76   :  { %4272 = vmatpush3.bf16.msra.mxu0 %v4271_v36  ;;  %4308 = vmatpush3.bf16.msra.mxu1 %v4307_v37 }
  0x77   :  { %4273 = vmatprep.subr.bf16.mxu0 %v4703_v0  ;;  %4309 = vmatprep.subr.bf16.mxu1 %v4703_v0 }
  0x79   :  { %3864 = vmatmul.mubr.f32.vlgmr.msra.gmra.mrb[0].mxu0 %v4896_v6  ;;  %3930 = vmatmul.mubr.f32.vlgmr.msra.gmra.mrb[0].mxu1 %v4896_v6 }
  0x7a   :  { %4275 = vmatpush3.bf16.msra.mxu0 %v4823_v16  ;;  %4311 = vmatpush3.bf16.msra.mxu1 %v4829_v19  ;;  %v3574_v16 = vld [vmem:[%s5495_s4 + $0x20] sm:$0xff]  ;;  %v3575_v19 = vld [vmem:[%s5495_s4 + $0x28] sm:$0xff] }
  0x7b   :  { %4276 = vmatprep.subr.bf16.mxu0 %v4703_v0  ;;  %4312 = vmatprep.subr.bf16.mxu1 %v4703_v0  ;;  %v1759_v39 = vand.u32 4294901760, %v3575_v19 }
  0x7c   :  { %3874 = vmatprep.mubr.msk.f32.mxu0 %vm4704_vm0, %v4705_v1  ;;  %3940 = vmatprep.mubr.msk.f32.mxu1 %vm4704_vm0, %v4705_v1 }
  0x7d   :  { %v1843_v59 = vsub.f32 %v3575_v19, %v1759_v39  ;;  %v5045_v19 = vpack.c.bf16 %v1265_v23, %v1258_v15 }
  0x7e   :  { %4278 = vmatpush3.bf16.msra.mxu0 %v4832_v20  ;;  %4314 = vmatpush3.bf16.msra.mxu1 %v4841_v26  ;;  %v74_v20 = vld [vmem:[%s5495_s4] sm:$0xff]  ;;  %v1756_v26 = vand.u32 4294901760, %v3574_v16 }
  0x7f   :  { %4363 = vmatprep.subr.bf16.mxu1 %v4703_v0  ;;  %v1134_v45 = vand.u32 4294901760, %v74_v20  ;;  %v1844_v2 = vand.u32 4294901760, %v1843_v59 }
  0x80   :  { %v5014_v53 = vpack.c.bf16 %v1759_v39, %v1756_v26  ;;  %v1836_v56 = vsub.f32 %v3574_v16, %v1756_v26  ;;  %v5043_v16 = vpack.c.bf16 %v1857_v8, %v1850_v7  ;;  %v5051_v39 = vpack.c.bf16 %v1858_v14, %v1851_v13 }
  0x81   :  { %3875 = vmatmul.mubr.f32.vlgmr.msra.gmra.mrb[0].mxu0 %v4896_v6  ;;  %3941 = vmatmul.mubr.f32.vlgmr.msra.gmra.mrb[0].mxu1 %v4896_v6  ;;  %v5016_v57 = vpack.c.bf16 %v1137_v48, %v1134_v45  ;;  %v1244_v62 = vsub.f32 %v74_v20, %v1134_v45  ;;  %v1845_v6 = vsub.f32 %v1843_v59, %v1844_v2  ;;  %v1109_v45 = vlaneseq }
  0x82   :  { %4035 = vmatprep.mubr.msk.f32.mxu1 %vm4704_vm0, %v4705_v1  ;;  %4365 = vmatpush3.bf16.msra.mxu1 %v5014_v53  ;;  %v1837_v61 = vand.u32 4294901760, %v1836_v56  ;;  %v5039_v36 = vpack.c.bf16 %v1843_v59, %v1836_v56 }
  0x83   :  { %4316 = vmatprep.subr.bf16.mxu0 %v5016_v57  ;;  %4366 = vmatprep.subr.bf16.mxu1 %v4703_v0  ;;  %v1245_v4 = vand.u32 4294901760, %v1244_v62  ;;  %v1846_v12 = vand.u32 4294901760, %v1845_v6  ;;  %v5041_v37 = vpack.c.bf16 %v1251_v63, %v1244_v62  ;;  %v5055_v48 = vshrl.u32 %v1109_v45, 7 }
  0x84   :  { %4318 = vmatpush3.bf16.msra.mxu0 %v5016_v57  ;;  %v1838_v3 = vsub.f32 %v1836_v56, %v1837_v61  ;;  %v5047_v20 = vpack.c.bf16 %v1844_v2, %v1837_v61  ;;  %v91_v2 = vld [vmem:[%s5491_s0 + $0x10] sm:$0xff] }
  0x85   :  { %4320 = vmatprep.subr.bf16.mxu0 %v5021_v60  ;;  %v1246_v10 = vsub.f32 %v1244_v62, %v1245_v4  ;;  %v5049_v26 = vpack.c.bf16 %v1252_v5, %v1245_v4  ;;  %v1111_v59 = vsub.s32 0, %v5055_v48  ;;  %v89_v62 = vld [vmem:[%s5491_s0] sm:$0xff] }
  0x86   :  { %4368 = vmatpush3.bf16.msra.mxu1 %v5018_v58  ;;  %v1839_v9 = vand.u32 4294901760, %v1838_v3  ;;  %v92_v3 = vld [vmem:[%s5491_s0 + $0x18] sm:$0x1] }
  0x87   :  { %4369 = vmatprep.subr.bf16.mxu1 %v4703_v0  ;;  %v1247_v21 = vand.u32 4294901760, %v1246_v10 }
  0x88   :  { %4322 = vmatpush3.bf16.msra.mxu0 %v5021_v60  ;;  %v5030_v24 = vpack.c.bf16 %v1846_v12, %v1839_v9 }
  0x89   :  { %v5032_v29 = vpack.c.bf16 %v1254_v22, %v1247_v21 }
  0x8b   :  { %4324 = vmatprep.subr.bf16.mxu0 %v5032_v29 }
 0x154   :  { %v614_v49 = vpop.f32.mrb[0].mxu0  ;;  %v1103_v50 = vpop.f32.mrb[0].mxu1 }
 0x155   :  { %v4483_v51 = vadd.f32 %v3579_v46, %v614_v49  ;;  %v4484_v52 = vadd.f32 %v3580_v47, %v1103_v50  ;;  %v3876_v54 = vpop.f32.mrb[1].mxu0  ;;  %v3942_v55 = vpop.f32.mrb[1].mxu1 }
 0x156   :  { %v2344_v55 = vsub.s32 1, %v5055_v48  ;;  %v3587_v48 = vld [vmem:[%s5491_s0 + $0x20] sm:$0xff] }
 0x157   :  { %v5057_v56 = vmul.f32 %v4484_v52, %v4483_v51 }
 0x159   :  { %v1108_v61 = vmax.f32 %v5057_v56, 0.0 }
 0x15b   :  { %v1112_v63 = vrot.slane %v1108_v61, %v1111_v59  ;;  %v2345_v59 = vrot.slane %v1108_v61, %v2344_v55  ;;  %v3589_v61 = vld [vmem:[%s5491_s0 + $0x30] sm:$0xff] }
 0x15d   :  { %v1113_v4 = vmul.f32 %v1112_v63, %v89_v62  ;;  %v1747_v5 = vmul.f32 %v1112_v63, %v4825_v17  ;;  %v1114_v6 = vmul.f32 %v1112_v63, %v4856_v40  ;;  %v1115_v7 = vmul.f32 %v1112_v63, %v91_v2 }
 0x15e   :  { %v1116_v8 = vmul.f32 %v1112_v63, %v92_v3  ;;  %v2346_v56 = vmul.f32 %v3587_v48, %v2345_v59  ;;  %v2977_v62 = vmul.f32 %v2345_v59, %v4827_v18  ;;  %v2347_v63 = vmul.f32 %v4863_v44, %v2345_v59 }
 0x15f   :  { %v1122_v9 = vsel %vm94_vm1, %v1113_v4, 0  ;;  %v1753_v10 = vsel %vm94_vm1, %v1747_v5, 0  ;;  %v1125_v11 = vsel %vm94_vm1, %v1114_v6, 0  ;;  %v1128_v15 = vsel %vm94_vm1, %v1115_v7, 0  ;;  %v3590_v4 = vld [vmem:[%s5491_s0 + $0x38] sm:$0x1] }
 0x160   :  { %v5077_v12 = vand.u32 4294901760, %v1122_v9  ;;  %v5079_v13 = vand.u32 4294901760, %v1753_v10  ;;  %v5081_v14 = vand.u32 4294901760, %v1125_v11  ;;  %v5084_v21 = vand.u32 4294901760, %v1128_v15 }
 0x161   :  { %v1131_v17 = vsel %vm94_vm1, %v1116_v8, 0  ;;  %v2351_v2 = vsel %vm94_vm1, %v2346_v56, 0  ;;  %v2348_v3 = vmul.f32 %v3589_v61, %v2345_v59  ;;  %v2979_v18 = vsel %vm94_vm1, %v2977_v62, 0 }
 0x162   :  { %v5088_v40 = vsub.f32 %v1122_v9, %v5077_v12  ;;  %v5091_v22 = vsub.f32 %v1753_v10, %v5079_v13  ;;  %v5094_v23 = vsub.f32 %v1125_v11, %v5081_v14  ;;  %v5096_v25 = vand.u32 4294901760, %v1131_v17 }
 0x163   :  { %v5099_v27 = vsub.f32 %v1128_v15, %v5084_v21  ;;  %v5190_v44 = vand.u32 4294901760, %v2351_v2  ;;  %v2354_v5 = vsel %vm94_vm1, %v2347_v63, 0  ;;  %v2349_v6 = vmul.f32 %v3590_v4, %v2345_v59 }
 0x164   :  { %v1204_v28 = vand.u32 4294901760, %v5088_v40  ;;  %v1826_v30 = vand.u32 4294901760, %v5091_v22  ;;  %v1214_v31 = vand.u32 4294901760, %v5094_v23  ;;  %v5105_v32 = vsub.f32 %v1131_v17, %v5096_v25 }
 0x165   :  { %v1224_v33 = vand.u32 4294901760, %v5099_v27  ;;  %v2357_v7 = vsel %vm94_vm1, %v2348_v3, 0  ;;  %v5199_v8 = vand.u32 4294901760, %v2979_v18  ;;  %v5203_v9 = vand.u32 4294901760, %v2354_v5 }
 0x166   :  { %v1205_v34 = vsub.f32 %v5088_v40, %v1204_v28  ;;  %v1827_v38 = vsub.f32 %v5091_v22, %v1826_v30  ;;  %v1215_v41 = vsub.f32 %v5094_v23, %v1214_v31  ;;  %v1234_v45 = vand.u32 4294901760, %v5105_v32 }
 0x167   :  { %v1225_v46 = vsub.f32 %v5099_v27, %v1224_v33  ;;  %v5207_v10 = vsub.f32 %v2351_v2, %v5190_v44  ;;  %v5209_v11 = vand.u32 4294901760, %v2357_v7  ;;  %v2360_v15 = vsel %vm94_vm1, %v2349_v6, 0 }
 0x168   :  { %v1206_v47 = vand.u32 4294901760, %v1205_v34  ;;  %v1828_v49 = vand.u32 4294901760, %v1827_v38  ;;  %v1216_v50 = vand.u32 4294901760, %v1215_v41  ;;  %v1235_v51 = vsub.f32 %v5105_v32, %v1234_v45 }
 0x169   :  { %v1226_v52 = vand.u32 4294901760, %v1225_v46  ;;  %v5217_v17 = vsub.f32 %v2979_v18, %v5199_v8 }
 0x16a   :  { %3951 = vmatprep.mubr.f32.mxu0 %v1206_v47  ;;  %4036 = vmatmul.mubr.f32.vlgmr.msra.gmra.mrb[2].mxu1 %v1828_v49  ;;  %v1236_v54 = vand.u32 4294901760, %v1235_v51 }
 0x16b   :  { %4371 = vmatpush3.bf16.msra.mxu1 %v5030_v24  ;;  %3952 = vmatmul.mubr.f32.vlgmr.msra.gmra.mrb[2].mxu0 %v1216_v50 }
 0x16c   :  { %3954 = vmatprep.mubr.f32.mxu0 %v1226_v52  ;;  %4326 = vmatpush3.bf16.msra.mxu0 %v5032_v29 }
 0x16d   :  { %4372 = vmatprep.subr.bf16.mxu1 %v4703_v0  ;;  %4328 = vmatprep.subr.bf16.mxu0 %v5037_v43 }
 0x16e   :  { %4046 = vmatprep.mubr.msk.f32.mxu1 %vm4704_vm0, %v4705_v1 }
 0x16f   :  { %4374 = vmatpush3.bf16.msra.mxu1 %v5035_v35  ;;  %3955 = vmatmul.mubr.f32.gmra.mrb[4].mxu0 %v1236_v54 }
 0x170   :  { %4330 = vmatpush3.bf16.msra.mxu0 %v5037_v43  ;;  %3965 = vmatprep.mubr.f32.mxu0 %v5077_v12 }
 0x171   :  { %4375 = vmatprep.subr.bf16.mxu1 %v4703_v0  ;;  %4332 = vmatprep.subr.bf16.mxu0 %v5041_v37 }
 0x172   :  { %4047 = vmatmul.mubr.f32.vlgmr.msra.gmra.mrb[2].mxu1 %v5079_v13 }
 0x173   :  { %4377 = vmatpush3.bf16.msra.mxu1 %v5039_v36  ;;  %3966 = vmatmul.mubr.f32.vlgmr.msra.gmra.mrb[2].mxu0 %v5081_v14 }
 0x174   :  { %3968 = vmatprep.mubr.f32.mxu0 %v5084_v21  ;;  %4334 = vmatpush3.bf16.msra.mxu0 %v5041_v37 }
 0x175   :  { %4378 = vmatprep.subr.bf16.mxu1 %v4703_v0  ;;  %4336 = vmatprep.subr.bf16.mxu0 %v5045_v19 }
 0x176   :  { %4057 = vmatprep.mubr.msk.f32.mxu1 %vm4704_vm0, %v4705_v1 }
 0x177   :  { %4380 = vmatpush3.bf16.msra.mxu1 %v5043_v16  ;;  %3969 = vmatmul.mubr.f32.gmra.mrb[4].mxu0 %v5096_v25 }
 0x178   :  { %4338 = vmatpush3.bf16.msra.mxu0 %v5045_v19  ;;  %3979 = vmatprep.mubr.f32.mxu0 %v5088_v40  ;;  %v5222_v40 = vsub.f32 %v2354_v5, %v5203_v9 }
 0x179   :  { %4381 = vmatprep.subr.bf16.mxu1 %v4703_v0  ;;  %4340 = vmatprep.subr.bf16.mxu0 %v5016_v57 }
 0x17a   :  { %4058 = vmatmul.mubr.f32.vlgmr.msra.gmra.mrb[2].mxu1 %v5091_v22  ;;  %v5224_v22 = vand.u32 4294901760, %v2360_v15 }
 0x17b   :  { %4383 = vmatpush3.bf16.msra.mxu1 %v5014_v53  ;;  %3980 = vmatmul.mubr.f32.vlgmr.msra.gmra.mrb[2].mxu0 %v5094_v23  ;;  %v2433_v23 = vand.u32 4294901760, %v5207_v10 }
 0x17c   :  { %3982 = vmatprep.mubr.f32.mxu0 %v5099_v27  ;;  %4342 = vmatpush3.bf16.msra.mxu0 %v5016_v57  ;;  %v5230_v27 = vsub.f32 %v2357_v7, %v5209_v11 }
 0x17d   :  { %4384 = vmatprep.subr.bf16.mxu1 %v4703_v0  ;;  %4344 = vmatprep.subr.bf16.mxu0 %v5021_v60 }
 0x17e   :  { %4068 = vmatprep.mubr.msk.f32.mxu1 %vm4704_vm0, %v4705_v1 }
 0x17f   :  { %4386 = vmatpush3.bf16.msra.mxu1 %v5018_v58  ;;  %3983 = vmatmul.mubr.f32.gmra.mrb[4].mxu0 %v5105_v32  ;;  %v2434_v32 = vsub.f32 %v5207_v10, %v2433_v23 }
 0x180   :  { %4346 = vmatpush3.bf16.msra.mxu0 %v5021_v60  ;;  %3993 = vmatprep.mubr.f32.mxu0 %v1204_v28  ;;  %v3052_v28 = vand.u32 4294901760, %v5217_v17 }
 0x181   :  { %4387 = vmatprep.subr.bf16.mxu1 %v4703_v0  ;;  %4348 = vmatprep.subr.bf16.mxu0 %v5049_v26  ;;  %v2435_v38 = vand.u32 4294901760, %v2434_v32 }
 0x182   :  { %4069 = vmatmul.mubr.f32.vlgmr.msra.gmra.mrb[2].mxu1 %v1826_v30  ;;  %v2443_v30 = vand.u32 4294901760, %v5222_v40 }
 0x183   :  { %4389 = vmatpush3.bf16.msra.mxu1 %v5047_v20  ;;  %3994 = vmatmul.mubr.f32.vlgmr.msra.gmra.mrb[2].mxu0 %v1214_v31  ;;  %v5241_v31 = vsub.f32 %v2360_v15, %v5224_v22 }
 0x184   :  { %3996 = vmatprep.mubr.f32.mxu0 %v1224_v33  ;;  %4350 = vmatpush3.bf16.msra.mxu0 %v5049_v26  ;;  %v2453_v33 = vand.u32 4294901760, %v5230_v27 }
 0x185   :  { %4390 = vmatprep.subr.bf16.mxu1 %v4703_v0  ;;  %4352 = vmatprep.subr.bf16.mxu0 %v5053_v42  ;;  %v2463_v34 = vand.u32 4294901760, %v5241_v31 }
 0x186   :  { %4079 = vmatprep.mubr.msk.f32.mxu1 %vm4704_vm0, %v4705_v1 }
 0x187   :  { %4392 = vmatpush3.bf16.msra.mxu1 %v5051_v39  ;;  %3997 = vmatmul.mubr.f32.gmra.mrb[4].mxu0 %v1234_v45  ;;  %v2464_v45 = vsub.f32 %v5241_v31, %v2463_v34 }
 0x188   :  { %4354 = vmatpush3.bf16.msra.mxu0 %v5053_v42  ;;  %4007 = vmatprep.mubr.f32.mxu0 %v5077_v12 }
 0x189   :  { %4393 = vmatprep.subr.bf16.mxu1 %v4703_v0  ;;  %4356 = vmatprep.subr.bf16.mxu0 %v5016_v57 }
 0x18a   :  { %4080 = vmatmul.mubr.f32.vlgmr.msra.gmra.mrb[2].mxu1 %v5079_v13 }
 0x18b   :  { %4395 = vmatpush3.bf16.msra.mxu1 %v5014_v53  ;;  %4008 = vmatmul.mubr.f32.vlgmr.msra.gmra.mrb[2].mxu0 %v5081_v14 }
 0x18c   :  { %4010 = vmatprep.mubr.f32.mxu0 %v5084_v21  ;;  %4358 = vmatpush3.bf16.msra.mxu0 %v5016_v57 }
 0x18d   :  { %4396 = vmatprep.subr.bf16.mxu1 %v4703_v0  ;;  %4360 = vmatprep.subr.bf16.mxu0 %v5021_v60 }
 0x18e   :  { %4090 = vmatprep.mubr.msk.f32.mxu1 %vm4704_vm0, %v4705_v1 }
 0x18f   :  { %4398 = vmatpush3.bf16.msra.mxu1 %v5018_v58  ;;  %4011 = vmatmul.mubr.f32.gmra.mrb[4].mxu0 %v5096_v25 }
 0x190   :  { %4362 = vmatpush3.bf16.msra.mxu0 %v5021_v60  ;;  %4021 = vmatprep.mubr.f32.mxu0 %v5077_v12  ;;  %v3053_v12 = vsub.f32 %v5217_v17, %v3052_v28 }
 0x191   :  { %4447 = vmatprep.subr.bf16.mxu1 %v4703_v0  ;;  %4400 = vmatprep.subr.bf16.mxu0 %v5016_v57 }
 0x192   :  { %4091 = vmatmul.mubr.f32.vlgmr.msra.gmra.mrb[2].mxu1 %v5079_v13  ;;  %v2444_v13 = vsub.f32 %v5222_v40, %v2443_v30 }
 0x193   :  { %4449 = vmatpush3.bf16.msra.mxu1 %v5014_v53  ;;  %4022 = vmatmul.mubr.f32.vlgmr.msra.gmra.mrb[2].mxu0 %v5081_v14  ;;  %v2454_v14 = vsub.f32 %v5230_v27, %v2453_v33 }
 0x194   :  { %4024 = vmatprep.mubr.f32.mxu0 %v5084_v21  ;;  %4402 = vmatpush3.bf16.msra.mxu0 %v5016_v57  ;;  %v3054_v21 = vand.u32 4294901760, %v3053_v12  ;;  %v2445_v41 = vand.u32 4294901760, %v2444_v13 }
 0x195   :  { %4450 = vmatprep.subr.bf16.mxu1 %v4703_v0  ;;  %4404 = vmatprep.subr.bf16.mxu0 %v5021_v60  ;;  %v2455_v46 = vand.u32 4294901760, %v2454_v14 }
 0x196   :  { %4185 = vmatprep.mubr.msk.f32.mxu1 %vm4704_vm0, %v4705_v1 }
 0x197   :  { %4452 = vmatpush3.bf16.msra.mxu1 %v5018_v58  ;;  %4025 = vmatmul.mubr.f32.gmra.mrb[4].mxu0 %v5096_v25  ;;  %v2465_v25 = vand.u32 4294901760, %v2464_v45 }
 0x198   :  { %4406 = vmatpush3.bf16.msra.mxu0 %v5021_v60  ;;  %4101 = vmatprep.mubr.f32.mxu0 %v2435_v38 }
 0x199   :  { %4453 = vmatprep.subr.bf16.mxu1 %v4703_v0  ;;  %4408 = vmatprep.subr.bf16.mxu0 %v5032_v29 }
 0x19a   :  { %4186 = vmatmul.mubr.f32.vlgmr.msra.gmra.mrb[4].mxu1 %v3054_v21 }
 0x19b   :  { %4455 = vmatpush3.bf16.msra.mxu1 %v5030_v24  ;;  %4102 = vmatmul.mubr.f32.vlgmr.msra.gmra.mrb[6].mxu0 %v2445_v41 }
 0x19c   :  { %4104 = vmatprep.mubr.f32.mxu0 %v2455_v46  ;;  %4410 = vmatpush3.bf16.msra.mxu0 %v5032_v29 }
 0x19d   :  { %4456 = vmatprep.subr.bf16.mxu1 %v4703_v0  ;;  %4412 = vmatprep.subr.bf16.mxu0 %v5037_v43 }
 0x19e   :  { %4196 = vmatprep.mubr.msk.f32.mxu1 %vm4704_vm0, %v4705_v1 }
 0x19f   :  { %4458 = vmatpush3.bf16.msra.mxu1 %v5035_v35  ;;  %4105 = vmatmul.mubr.f32.gmra.mrb[8].mxu0 %v2465_v25 }
 0x1a0   :  { %4414 = vmatpush3.bf16.msra.mxu0 %v5037_v43  ;;  %4115 = vmatprep.mubr.f32.mxu0 %v5190_v44 }
 0x1a1   :  { %4459 = vmatprep.subr.bf16.mxu1 %v4703_v0  ;;  %4416 = vmatprep.subr.bf16.mxu0 %v5041_v37 }
 0x1a2   :  { %4197 = vmatmul.mubr.f32.vlgmr.msra.gmra.mrb[4].mxu1 %v5199_v8 }
 0x1a3   :  { %4461 = vmatpush3.bf16.msra.mxu1 %v5039_v36  ;;  %4116 = vmatmul.mubr.f32.vlgmr.msra.gmra.mrb[6].mxu0 %v5203_v9 }
 0x1a4   :  { %4118 = vmatprep.mubr.f32.mxu0 %v5209_v11  ;;  %4418 = vmatpush3.bf16.msra.mxu0 %v5041_v37 }
 0x1a5   :  { %4462 = vmatprep.subr.bf16.mxu1 %v4703_v0  ;;  %4420 = vmatprep.subr.bf16.mxu0 %v5045_v19 }
 0x1a6   :  { %4207 = vmatprep.mubr.msk.f32.mxu1 %vm4704_vm0, %v4705_v1 }
 0x1a7   :  { %4464 = vmatpush3.bf16.msra.mxu1 %v5043_v16  ;;  %4119 = vmatmul.mubr.f32.gmra.mrb[8].mxu0 %v5224_v22 }
 0x1a8   :  { %4422 = vmatpush3.bf16.msra.mxu0 %v5045_v19  ;;  %4129 = vmatprep.mubr.f32.mxu0 %v5207_v10 }
 0x1a9   :  { %4465 = vmatprep.subr.bf16.mxu1 %v4703_v0  ;;  %4424 = vmatprep.subr.bf16.mxu0 %v5016_v57 }
 0x1aa   :  { %4208 = vmatmul.mubr.f32.vlgmr.msra.gmra.mrb[4].mxu1 %v5217_v17 }
 0x1ab   :  { %4467 = vmatpush3.bf16.msra.mxu1 %v5014_v53  ;;  %4130 = vmatmul.mubr.f32.vlgmr.msra.gmra.mrb[6].mxu0 %v5222_v40 }
 0x1ac   :  { %4132 = vmatprep.mubr.f32.mxu0 %v5230_v27  ;;  %4426 = vmatpush3.bf16.msra.mxu0 %v5016_v57 }
 0x1ad   :  { %4468 = vmatprep.subr.bf16.mxu1 %v4703_v0  ;;  %4428 = vmatprep.subr.bf16.mxu0 %v5021_v60 }
 0x1ae   :  { %4218 = vmatprep.mubr.msk.f32.mxu1 %vm4704_vm0, %v4705_v1 }
 0x1af   :  { %4470 = vmatpush3.bf16.msra.mxu1 %v5018_v58  ;;  %4133 = vmatmul.mubr.f32.gmra.mrb[8].mxu0 %v5241_v31 }
 0x1b0   :  { %4430 = vmatpush3.bf16.msra.mxu0 %v5021_v60  ;;  %4143 = vmatprep.mubr.f32.mxu0 %v2433_v23 }
 0x1b1   :  { %4471 = vmatprep.subr.bf16.mxu1 %v4703_v0  ;;  %4432 = vmatprep.subr.bf16.mxu0 %v5049_v26 }
 0x1b2   :  { %4219 = vmatmul.mubr.f32.vlgmr.msra.gmra.mrb[4].mxu1 %v3052_v28 }
 0x1b3   :  { %4473 = vmatpush3.bf16.msra.mxu1 %v5047_v20  ;;  %4144 = vmatmul.mubr.f32.vlgmr.msra.gmra.mrb[6].mxu0 %v2443_v30 }
 0x1b4   :  { %4146 = vmatprep.mubr.f32.mxu0 %v2453_v33  ;;  %4434 = vmatpush3.bf16.msra.mxu0 %v5049_v26 }
 0x1b5   :  { %4474 = vmatprep.subr.bf16.mxu1 %v4703_v0  ;;  %4436 = vmatprep.subr.bf16.mxu0 %v5053_v42 }
 0x1b6   :  { %4229 = vmatprep.mubr.msk.f32.mxu1 %vm4704_vm0, %v4705_v1 }
 0x1b7   :  { %4476 = vmatpush3.bf16.msra.mxu1 %v5051_v39  ;;  %4147 = vmatmul.mubr.f32.gmra.mrb[8].mxu0 %v2463_v34 }
 0x1b8   :  { %4438 = vmatpush3.bf16.msra.mxu0 %v5053_v42  ;;  %4157 = vmatprep.mubr.f32.mxu0 %v5190_v44 }
 0x1b9   :  { %4477 = vmatprep.subr.bf16.mxu1 %v4703_v0  ;;  %4440 = vmatprep.subr.bf16.mxu0 %v5016_v57 }
 0x1ba   :  { %4230 = vmatmul.mubr.f32.vlgmr.msra.gmra.mrb[4].mxu1 %v5199_v8 }
 0x1bb   :  { %4479 = vmatpush3.bf16.msra.mxu1 %v5014_v53  ;;  %4158 = vmatmul.mubr.f32.vlgmr.msra.gmra.mrb[6].mxu0 %v5203_v9  ;;  %v3581_v53 = vld [vmem:[#allocation7] ss:$0 sm:$0xff] }
 0x1bc   :  { %4160 = vmatprep.mubr.f32.mxu0 %v5209_v11  ;;  %4442 = vmatpush3.bf16.msra.mxu0 %v5016_v57 }
 0x1bd   :  { %4480 = vmatprep.subr.bf16.mxu1 %v4703_v0  ;;  %4444 = vmatprep.subr.bf16.mxu0 %v5021_v60  ;;  %v3582_v0 = vld [vmem:[#allocation7 + $0x3] ss:$0 sm:$0xff] }
 0x1be   :  { %4240 = vmatprep.mubr.msk.f32.mxu1 %vm4704_vm0, %v4705_v1 }
 0x1bf   :  { %4482 = vmatpush3.bf16.msra.mxu1 %v5018_v58  ;;  %4161 = vmatmul.mubr.f32.gmra.mrb[8].mxu0 %v5224_v22 }
 0x1c0   :  { %4446 = vmatpush3.bf16.msra.mxu0 %v5021_v60  ;;  %4171 = vmatprep.mubr.f32.mxu0 %v5190_v44 }
 0x1c2   :  { %4241 = vmatmul.mubr.f32.vlgmr.msra.gmra.mrb[4].mxu1 %v5199_v8 }
 0x1c3   :  { %4172 = vmatmul.mubr.f32.vlgmr.msra.gmra.mrb[6].mxu0 %v5203_v9 }
 0x1c4   :  { %4174 = vmatprep.mubr.f32.mxu0 %v5209_v11 }
 0x1c7   :  { %4175 = vmatmul.mubr.f32.gmra.mrb[8].mxu0 %v5224_v22 }
 0x265   :  { %v2236_v57 = vpop.f32.mrb[2].mxu1 }
 0x266   :  { %v4489_v1 = vadd.f32 %v3582_v0, %v2236_v57  ;;  %v4023_v24 = vpop.f32.mrb[2].mxu0  ;;  %v4092_v58 = vpop.f32.mrb[3].mxu1 }
 0x267   :  { %v4485_v29 = vadd.f32 %v4023_v24, %v3581_v53  ;;  %v1725_v35 = vpop.f32.mrb[3].mxu0 }
 0x268   :  { %v2314_v60 = vsel %vm94_vm1, %v4489_v1, 0.0  ;;  %v4486_v43 = vadd.f32 %v3581_v53, %v1725_v35 }
 0x269   :  { %2315 = vadd.xlane.f32.xlu0 %v2314_v60  ;;  %v2243_v36 = vsel %vm94_vm1, %v4485_v29, 0.0 }
 0x26a   :  { %2244 = vadd.xlane.f32.xlu1 %v2243_v36  ;;  %v4026_v37 = vpop.f32.mrb[4].mxu0  ;;  %v2240_v26 = vsel %vm94_vm1, %v4486_v43, 0.0 }
 0x26b   :  { %v1737_v16 = vpop.f32.mrb[5].mxu0  ;;  %v4487_v20 = vadd.f32 %v4026_v37, %v3581_v53 }
 0x26c   :  { %v4488_v19 = vadd.f32 %v3581_v53, %v1737_v16 }
 0x26d   :  { %v2250_v42 = vsel %vm2249_vm3, %v4487_v20, 0.0 }
 0x26e   :  { %2241 = vadd.xlane.f32.xlu1 %v2240_v26  ;;  %v2246_v39 = vsel %vm94_vm1, %v4488_v19, 0.0 }
 0x26f   :  { %2247 = vadd.xlane.f32.xlu0 %v2246_v39 }
 0x272   :  { %2251 = vadd.xlane.f32.xlu1 %v2250_v42 }
 0x295   :  { %v3462_v47 = vpop.f32.mrb[4].mxu1 }
 0x296   :  { %v4494_v49 = vadd.f32 %v3582_v0, %v3462_v47  ;;  %v4242_v50 = vpop.f32.mrb[5].mxu1  ;;  %v4173_v51 = vpop.f32.mrb[6].mxu0 }
 0x297   :  { %v4490_v52 = vadd.f32 %v4173_v51, %v3581_v53  ;;  %v2954_v54 = vpop.f32.mrb[7].mxu0 }
 0x298   :  { %v4491_v55 = vadd.f32 %v3581_v53, %v2954_v54  ;;  %v3531_v59 = vsel %vm94_vm1, %v4494_v49, 0.0 }
 0x299   :  { %3532 = vadd.xlane.f32.xlu0 %v3531_v59  ;;  %v3469_v48 = vsel %vm94_vm1, %v4490_v52, 0.0 }
 0x29a   :  { %v4176_v56 = vpop.f32.mrb[8].mxu0  ;;  %3470 = vadd.xlane.f32.xlu1 %v3469_v48  ;;  %v3466_v61 = vsel %vm94_vm1, %v4491_v55, 0.0 }
 0x29b   :  { %v4492_v62 = vadd.f32 %v4176_v56, %v3581_v53  ;;  %v2966_v63 = vpop.f32.mrb[9].mxu0 }
 0x29c   :  { %v4493_v2 = vadd.f32 %v3581_v53, %v2966_v63 }
 0x29d   :  { %3467 = vadd.xlane.f32.xlu0 %v3466_v61  ;;  %v3475_v3 = vsel %vm2249_vm3, %v4492_v62, 0.0 }
 0x29e   :  { %3476 = vadd.xlane.f32.xlu1 %v3475_v3  ;;  %v3472_v4 = vsel %vm94_vm1, %v4493_v2, 0.0 }
 0x2a1   :  { %3473 = vadd.xlane.f32.xlu0 %v3472_v4 }
 0x2f6   :  { %v2316_v18 = vpop.xlane.xlu0 %2315 }
 0x2f7   :  { %v2317_v44 = vmul.f32 0.03125, %v2316_v18  ;;  %v2245_v5 = vpop.xlane.xlu1 %2244 }
 0x2f8   :  { %v2255_v6 = vmul.f32 0.03125, %v2245_v5  ;;  %v3585_v5 = vld [vmem:[#allocation7 + $0x4] ss:$0 sm:$0xff] }
 0x2f9   :  { %v5362_v7 = vsub.f32 %v4489_v1, %v2317_v44 }
 0x2fa   :  { %v5364_v8 = vsub.f32 %v4485_v29, %v2255_v6 }
 0x2fb   :  { %v2242_v9 = vpop.xlane.xlu1 %2241  ;;  %v2319_v10 = vmul.f32 %v5362_v7, %v5362_v7 }
 0x2fc   :  { %v2254_v11 = vmul.f32 0.03125, %v2242_v9  ;;  %v2248_v15 = vpop.xlane.xlu0 %2247  ;;  %v2263_v17 = vmul.f32 %v5364_v8, %v5364_v8  ;;  %v5412_v9 = vld [vmem:[#allocation7 + $0x1] ss:$0 sm:$0xff] }
 0x2fd   :  { %v2256_v40 = vmul.f32 0.03125, %v2248_v15  ;;  %v2320_v22 = vsel %vm94_vm1, %v2319_v10, 0.0  ;;  %v3586_v15 = vld [vmem:[#allocation7 + $0x5] ss:$0 sm:$0xff] }
 0x2fe   :  { %v5371_v23 = vsub.f32 %v4486_v43, %v2254_v11  ;;  %2321 = vadd.xlane.f32.xlu0 %v2320_v22  ;;  %v2269_v27 = vsel %vm94_vm1, %v2263_v17, 0.0  ;;  %v5416_v17 = vld [vmem:[#allocation7 + $0x2] ss:$0 sm:$0xff] }
 0x2ff   :  { %v5374_v28 = vsub.f32 %v4488_v19, %v2256_v40  ;;  %2270 = vadd.xlane.f32.xlu1 %v2269_v27  ;;  %v2252_v30 = vpop.xlane.xlu1 %2251 }
 0x300   :  { %v2257_v31 = vmul.f32 0.03125, %v2252_v30  ;;  %v2262_v32 = vmul.f32 %v5371_v23, %v5371_v23 }
 0x301   :  { %v2264_v13 = vmul.f32 %v5374_v28, %v5374_v28 }
 0x302   :  { %v5378_v33 = vsub.f32 %v4487_v20, %v2257_v31  ;;  %v2266_v12 = vsel %vm94_vm1, %v2262_v32, 0.0 }
 0x303   :  { %2267 = vadd.xlane.f32.xlu0 %v2266_v12  ;;  %v2272_v38 = vsel %vm94_vm1, %v2264_v13, 0.0 }
 0x304   :  { %v2265_v34 = vmul.f32 %v5378_v33, %v5378_v33 }
 0x306   :  { %v2275_v14 = vsel %vm2249_vm3, %v2265_v34, 0.0 }
 0x307   :  { %2273 = vadd.xlane.f32.xlu0 %v2272_v38  ;;  %2276 = vadd.xlane.f32.xlu1 %v2275_v14 }
 0x326   :  { %v3533_v21 = vpop.xlane.xlu0 %3532 }
 0x327   :  { %v3534_v41 = vmul.f32 0.03125, %v3533_v21  ;;  %v3471_v45 = vpop.xlane.xlu1 %3470 }
 0x328   :  { %v3479_v46 = vmul.f32 0.03125, %v3471_v45 }
 0x329   :  { %v5387_v25 = vsub.f32 %v4494_v49, %v3534_v41 }
 0x32a   :  { %v5389_v0 = vsub.f32 %v4490_v52, %v3479_v46  ;;  %v3468_v53 = vpop.xlane.xlu0 %3467 }
 0x32b   :  { %v3478_v57 = vmul.f32 0.03125, %v3468_v53  ;;  %v3477_v1 = vpop.xlane.xlu1 %3476  ;;  %v3536_v24 = vmul.f32 %v5387_v25, %v5387_v25 }
 0x32c   :  { %v3481_v58 = vmul.f32 0.03125, %v3477_v1  ;;  %v3487_v60 = vmul.f32 %v5389_v0, %v5389_v0 }
 0x32d   :  { %v5393_v29 = vsub.f32 %v4491_v55, %v3478_v57  ;;  %v3537_v35 = vsel %vm94_vm1, %v3536_v24, 0.0 }
 0x32e   :  { %v5398_v43 = vsub.f32 %v4492_v62, %v3481_v58  ;;  %v3474_v36 = vpop.xlane.xlu0 %3473  ;;  %3538 = vadd.xlane.f32.xlu1 %v3537_v35  ;;  %v3493_v26 = vsel %vm94_vm1, %v3487_v60, 0.0 }
 0x32f   :  { %v3480_v37 = vmul.f32 0.03125, %v3474_v36  ;;  %v3486_v16 = vmul.f32 %v5393_v29, %v5393_v29 }
 0x330   :  { %v3489_v39 = vmul.f32 %v5398_v43, %v5398_v43 }
 0x331   :  { %v5402_v19 = vsub.f32 %v4493_v2, %v3480_v37  ;;  %v3490_v20 = vsel %vm94_vm1, %v3486_v16, 0.0 }
 0x332   :  { %3491 = vadd.xlane.f32.xlu0 %v3490_v20  ;;  %3494 = vadd.xlane.f32.xlu1 %v3493_v26  ;;  %v3499_v49 = vsel %vm2249_vm3, %v3489_v39, 0.0 }
 0x333   :  { %v3488_v42 = vmul.f32 %v5402_v19, %v5402_v19 }
 0x335   :  { %v3496_v47 = vsel %vm94_vm1, %v3488_v42, 0.0 }
 0x336   :  { %3497 = vadd.xlane.f32.xlu0 %v3496_v47  ;;  %3500 = vadd.xlane.f32.xlu1 %v3499_v49 }
 0x38b   :  { %v2322_v50 = vpop.xlane.xlu0 %2321 }
 0x38c   :  { %v2323_v51 = vmul.f32 0.03125, %v2322_v50  ;;  %v2271_v52 = vpop.xlane.xlu1 %2270 }
 0x38d   :  { %v2279_v54 = vmul.f32 0.03125, %v2271_v52 }
 0x38e   :  { %v2324_v55 = vadd.f32 1e-05, %v2323_v51 }
 0x38f   :  { %v2283_v59 = vadd.f32 1e-05, %v2279_v54 }
 0x390   :  { %4584 = vrsqrt.f32 %v2324_v55  ;;  %v2268_v48 = vpop.xlane.xlu0 %2267 }
 0x391   :  { %4586 = vrsqrt.f32 %v2283_v59  ;;  %v2278_v56 = vmul.f32 0.03125, %v2268_v48 }
 0x393   :  { %v2282_v61 = vadd.f32 1e-05, %v2278_v56 }
 0x394   :  { %v2274_v62 = vpop.xlane.xlu0 %2273  ;;  %v2277_v63 = vpop.xlane.xlu1 %2276 }
 0x395   :  { %4588 = vrsqrt.f32 %v2282_v61  ;;  %v2280_v2 = vmul.f32 0.03125, %v2274_v62  ;;  %v2281_v3 = vmul.f32 0.03125, %v2277_v63 }
 0x397   :  { %v2284_v4 = vadd.f32 1e-05, %v2280_v2  ;;  %v2285_v18 = vadd.f32 1e-05, %v2281_v3 }
 0x399   :  { %4590 = vrsqrt.f32 %v2284_v4 }
 0x39a   :  { %v4585_v44 = vpop.eup %4584  ;;  %4592 = vrsqrt.f32 %v2285_v18 }
 0x39b   :  { %v4587_v6 = vpop.eup %4586  ;;  %v2326_v10 = vmul.f32 %v4585_v44, %v5362_v7 }
 0x39c   :  { %v2291_v11 = vmul.f32 %v4587_v6, %v5364_v8 }
 0x39d   :  { %v2331_v40 = vmul.f32 %v3585_v5, %v2326_v10 }
 0x39e   :  { %v2299_v22 = vmul.f32 %v5412_v9, %v2291_v11 }
 0x39f   :  { %v4589_v27 = vpop.eup %4588  ;;  %v2336_v30 = vadd.f32 %v3586_v15, %v2331_v40 }
 0x3a0   :  { %v2307_v31 = vadd.f32 %v5416_v17, %v2299_v22  ;;  %v2290_v32 = vmul.f32 %v4589_v27, %v5371_v23 }
 0x3a1   :  { %2337 = vst.msk [vmem:[#allocation8] sm:$0xff] %vm94_vm1, %v2336_v30 }
 0x3a2   :  { %2311 = vst.msk [vmem:[%s5497_s6 + $0x8] sm:$0xff] %vm94_vm1, %v2307_v31  ;;  %v2298_v7 = vmul.f32 %v5412_v9, %v2290_v32 }
 0x3a3   :  { %v4591_v8 = vpop.eup %4590 }
 0x3a4   :  { %v4593_v12 = vpop.eup %4592  ;;  %v2306_v13 = vadd.f32 %v5416_v17, %v2298_v7  ;;  %v2292_v34 = vmul.f32 %v4591_v8, %v5374_v28 }
 0x3a5   :  { %v2293_v38 = vmul.f32 %v4593_v12, %v5378_v33 }
 0x3a6   :  { %2310 = vst.msk [vmem:[%s5497_s6] sm:$0xff] %vm94_vm1, %v2306_v13  ;;  %v2300_v23 = vmul.f32 %v5412_v9, %v2292_v34 }
 0x3a7   :  { %v2301_v14 = vmul.f32 %v5412_v9, %v2293_v38 }
 0x3a8   :  { %v2308_v21 = vadd.f32 %v5416_v17, %v2300_v23 }
 0x3a9   :  { %v2309_v41 = vadd.f32 %v5416_v17, %v2301_v14 }
 0x3aa   :  { %2312 = vst.msk [vmem:[%s5497_s6 + $0x10] sm:$0xff] %vm94_vm1, %v2308_v21 }
 0x3ab   :  { %2313 = vst.msk [vmem:[%s5497_s6 + $0x18] sm:$0x1] %vm2249_vm3, %v2309_v41 }
 0x3bb   :  { %v3539_v28 = vpop.xlane.xlu1 %3538 }
 0x3bc   :  { %v3540_v33 = vmul.f32 0.03125, %v3539_v28 }
 0x3be   :  { %v3541_v45 = vadd.f32 1e-05, %v3540_v33 }
 0x3bf   :  { %v3492_v46 = vpop.xlane.xlu0 %3491  ;;  %v3495_v53 = vpop.xlane.xlu1 %3494 }
 0x3c0   :  { %4594 = vrsqrt.f32 %v3541_v45  ;;  %v3502_v57 = vmul.f32 0.03125, %v3492_v46  ;;  %v3503_v1 = vmul.f32 0.03125, %v3495_v53 }
 0x3c2   :  { %v3506_v24 = vadd.f32 1e-05, %v3502_v57  ;;  %v3507_v58 = vadd.f32 1e-05, %v3503_v1 }
 0x3c3   :  { %v3498_v35 = vpop.xlane.xlu0 %3497  ;;  %v3501_v60 = vpop.xlane.xlu1 %3500 }
 0x3c4   :  { %4596 = vrsqrt.f32 %v3506_v24  ;;  %v3504_v36 = vmul.f32 0.03125, %v3498_v35  ;;  %v3505_v37 = vmul.f32 0.03125, %v3501_v60 }
 0x3c5   :  { %4598 = vrsqrt.f32 %v3507_v58 }
 0x3c6   :  { %v3508_v16 = vadd.f32 1e-05, %v3504_v36  ;;  %v3509_v20 = vadd.f32 1e-05, %v3505_v37 }
 0x3c8   :  { %4600 = vrsqrt.f32 %v3508_v16 }
 0x3c9   :  { %4602 = vrsqrt.f32 %v3509_v20 }
 0x3ca   :  { %v4595_v26 = vpop.eup %4594 }
 0x3cb   :  { %v3543_v39 = vmul.f32 %v4595_v26, %v5387_v25 }
 0x3cd   :  { %v3544_v42 = vmul.f32 %v3585_v5, %v3543_v39 }
 0x3ce   :  { %v4597_v47 = vpop.eup %4596 }
 0x3cf   :  { %v4599_v49 = vpop.eup %4598  ;;  %v3514_v50 = vmul.f32 %v4597_v47, %v5393_v29  ;;  %v3545_v51 = vadd.f32 %v3586_v15, %v3544_v42 }
 0x3d0   :  { %v3515_v52 = vmul.f32 %v4599_v49, %v5389_v0 }
 0x3d1   :  { %v3518_v54 = vmul.f32 %v5412_v9, %v3514_v50  ;;  %3547 = vst.msk [vmem:[#allocation8 + $0x8] sm:$0xff] %vm94_vm1, %v3545_v51 }
 0x3d2   :  { %v4601_v55 = vpop.eup %4600  ;;  %v3519_v59 = vmul.f32 %v5412_v9, %v3515_v52 }
 0x3d3   :  { %4681 = shalt.err (!%p4678_p0)
}
 0x3d4   :  { %s4682_s22 = scalar_lea.hbm %s5498_s7, 256 }
 0x3d5   :  { %p4683_p1 = scmp.ne.s32.totalorder %s5498_s7, %s4682_s22  ;;  %p4686_p2 = scmp.lt.u32.totalorder %s4682_s22, %s5498_s7 }
 0x3d7   :  { %p4688_p3 = pnand %p4686_p2, %p4683_p1 }
 0x3d9   :  { %4691 = shalt.err (!%p4688_p3)
}
 0x3da   :  { %3561 = dma.vmem_to_hbm [thread:$0]  %s3556_s18, 256, %s5498_s7, [#allocation4], %s4700_s3, %s4700_s3, %s4701_s23   ;;  %v4603_v25 = vpop.eup %4602  ;;  %v3522_v0 = vadd.f32 %v5416_v17, %v3518_v54  ;;  %v3516_v29 = vmul.f32 %v4601_v55, %v5402_v19  ;;  %v3523_v48 = vadd.f32 %v5416_v17, %v3519_v59 }
 0x3db   :  { %v3517_v56 = vmul.f32 %v4603_v25, %v5398_v43 }
 0x3dc   :  { %3591 = vst.msk [vmem:[%s5497_s6 + $0x20] sm:$0xff] %vm94_vm1, %v3522_v0  ;;  %v3520_v61 = vmul.f32 %v5412_v9, %v3516_v29  ;;  %3592 = vst.msk [vmem:[%s5497_s6 + $0x28] sm:$0xff] %vm94_vm1, %v3523_v48 }
 0x3dd   :  { %v3521_v62 = vmul.f32 %v5412_v9, %v3517_v56 }
 0x3de   :  { %v3524_v19 = vadd.f32 %v5416_v17, %v3520_v61 }
 0x3df   :  { %v3525_v63 = vadd.f32 %v5416_v17, %v3521_v62 }
 0x3e0   :  { %3593 = vst.msk [vmem:[%s5497_s6 + $0x30] sm:$0xff] %vm94_vm1, %v3524_v19 }
 0x3e1   :  { %3594 = vst.msk [vmem:[%s5497_s6 + $0x38] sm:$0x1] %vm2249_vm3, %v3525_v63 }
 0x3e2   :  { %4696 = dma.done.wait [#allocation4], 256  }
 0x3e3   :  { %4697 = vsyncadd [#allocation4], 4294967040 }
 0x3e4   :  { %3567 = vsyncpa [#allocation3], 1 }
 0x3e5   :  { %3568 = vsyncpa [#allocation6], 1 }
 0x3e6   :  { %3569 = vsyncpa [#allocation4], 1 }

</bundles_post_ra>
